<compile_context>
chip_gen: v7x
topology: tpu7x:2x2x1
jax: 0.10.0
libtpu: 0.0.40
codegen_flags: <defaults>
</compile_context>

<pallas_src>
import numpy as np
import jax
import jax.numpy as jnp
from jax.experimental import pallas as pl
from jax.experimental.pallas import tpu as pltpu


# ----------------------------------------------------------------------------
# Fused kernels: trunk projection + first_lc + nlst_cat
# ----------------------------------------------------------------------------
def _pixel_kernel_single(x_ref, wtr_ref, btr_ref, w1_ref, b1_ref, w2_ref,
                         b2_ref, out_ref):
    # Trunk stand-in: (B, F) @ (F, C), bf16 inputs, f32 MXU accumulation.
    feats = (jnp.dot(x_ref[...], wtr_ref[...],
                     preferred_element_type=jnp.float32) + btr_ref[...])
    # first_lc: Dropout (identity, eval) -> ReLU -> Linear(C, 32)
    h = (jnp.dot(jnp.maximum(feats, 0.0), w1_ref[...],
                 preferred_element_type=jnp.float32) + b1_ref[...])
    # nlst_cat: Dropout (identity, eval) -> ReLU -> Linear(32, 2)
    out_ref[...] = (jnp.dot(jnp.maximum(h, 0.0), w2_ref[...],
                            preferred_element_type=jnp.float32) + b2_ref[...])


def _pixel_kernel_ktiled(x_ref, wtr_ref, btr_ref, w1_ref, b1_ref, w2_ref,
                         b2_ref, out_ref, feat_acc):
    # K is a reduction axis ("arbitrary"); never mark it "parallel".
    k = pl.program_id(0)

    @pl.when(k == 0)
    def _():
        feat_acc[...] = jnp.zeros_like(feat_acc)

    feat_acc[...] += jnp.dot(x_ref[...], wtr_ref[...],
                             preferred_element_type=jnp.float32)

    @pl.when(k == pl.num_programs(0) - 1)
    def _():
        feats = feat_acc[...] + btr_ref[...]
        h = (jnp.dot(jnp.maximum(feats, 0.0), w1_ref[...],
                     preferred_element_type=jnp.float32) + b1_ref[...])
        out_ref[...] = (jnp.dot(jnp.maximum(h, 0.0), w2_ref[...],
                                preferred_element_type=jnp.float32)
                        + b2_ref[...])


# Keep each bf16 W_trunk tile <= ~8 MiB: double-buffered that is 16 MiB, which
# together with the x tile and resident head weights stays well under v7x's
# 64 MiB physical VMEM (and trivially under v5e/v6e's 128 MiB).
_W_TILE_BYTES_CAP = 8 * 1024 * 1024
_VMEM_LIMIT_BYTES = 48 * 1024 * 1024


def pixel_forward(x, params):
    """x: (B, T, D, H, W) float32 -> (B, 2) float32."""
    B = x.shape[0]
    F = x.shape[2] * x.shape[3] * x.shape[4]
    C = params["W_trunk"].shape[1]

    # Last-frame slice + flatten + bf16 cast stays in the wrapper (one tiny
    # fused XLA copy; negligible vs. streaming W_trunk).
    # TODO(synk): fold the slice into the kernel via a Squeezed T BlockSpec dim
    # if the real trunk input volume becomes large.
    x_last = x[:, -1].reshape(B, F).astype(jnp.bfloat16)
    w_trunk = params["W_trunk"].astype(jnp.bfloat16)

    flops = 2 * B * F * C + 2 * B * C * 32 + 2 * B * 32 * 2
    bytes_accessed = (2 * (B * F + F * C)                       # bf16 streams
                      + 4 * (C + C * 32 + 32 + 32 * 2 + 2 + B * 2))
    cost = pl.CostEstimate(flops=flops, transcendentals=0,
                           bytes_accessed=bytes_accessed)

    # Biggest lane-aligned K tile whose bf16 weight slab fits the VMEM cap.
    tk_cap = max(128, (_W_TILE_BYTES_CAP // (2 * C)) // 128 * 128)

    head_args = (params["b_trunk"], params["W1"], params["b1"],
                 params["W2"], params["b2"])

    if F <= tk_cap:
        # ------- single-step path: no K grid, no accumulator (demo size) -------
        return pl.pallas_call(
            _pixel_kernel_single,
            out_shape=jax.ShapeDtypeStruct((B, 2), jnp.float32),
            grid_spec=pltpu.PrefetchScalarGridSpec(
                num_scalar_prefetch=0,
                grid=(1,),
                in_specs=[
                    pl.BlockSpec((B, F), lambda k: (0, 0)),    # x_last (bf16)
                    pl.BlockSpec((F, C), lambda k: (0, 0)),    # W_trunk (bf16)
                    pl.BlockSpec((1, C), lambda k: (0, 0)),    # b_trunk
                    pl.BlockSpec((C, 32), lambda k: (0, 0)),   # W1 (first_lc)
                    pl.BlockSpec((1, 32), lambda k: (0, 0)),   # b1
                    pl.BlockSpec((32, 2), lambda k: (0, 0)),   # W2 (nlst_cat)
                    pl.BlockSpec((1, 2), lambda k: (0, 0)),    # b2
                ],
                out_specs=pl.BlockSpec((B, 2), lambda k: (0, 0)),
            ),
            compiler_params=pltpu.CompilerParams(
                dimension_semantics=("arbitrary",),
                vmem_limit_bytes=_VMEM_LIMIT_BYTES),
            cost_estimate=cost,
        )(x_last, w_trunk, *head_args)

    # ------- K-tiled path for large trunk feature counts -------
    tk = tk_cap
    nk = pl.cdiv(F, tk)
    F_pad = nk * tk
    if F_pad != F:
        # zero-pad the contraction axis; zeros do not change the result.
        x_last = jnp.pad(x_last, ((0, 0), (0, F_pad - F)))
        w_trunk = jnp.pad(w_trunk, ((0, F_pad - F), (0, 0)))

    return pl.pallas_call(
        _pixel_kernel_ktiled,
        out_shape=jax.ShapeDtypeStruct((B, 2), jnp.float32),
        grid_spec=pltpu.PrefetchScalarGridSpec(
            num_scalar_prefetch=0,
            grid=(nk,),
            in_specs=[
                pl.BlockSpec((B, tk), lambda k: (0, k)),       # x_last (bf16)
                pl.BlockSpec((tk, C), lambda k: (k, 0)),       # W_trunk (bf16)
                pl.BlockSpec((1, C), lambda k: (0, 0)),        # b_trunk
                pl.BlockSpec((C, 32), lambda k: (0, 0)),       # W1
                pl.BlockSpec((1, 32), lambda k: (0, 0)),       # b1
                pl.BlockSpec((32, 2), lambda k: (0, 0)),       # W2
                pl.BlockSpec((1, 2), lambda k: (0, 0)),        # b2
            ],
            out_specs=pl.BlockSpec((B, 2), lambda k: (0, 0)),
            scratch_shapes=[pltpu.VMEM((B, C), jnp.float32)],  # trunk accumulator
        ),
        compiler_params=pltpu.CompilerParams(
            dimension_semantics=("arbitrary",),                # K is a reduction
            vmem_limit_bytes=_VMEM_LIMIT_BYTES),
        cost_estimate=cost,
    )(x_last, w_trunk, *head_args)


# ----------------------------------------------------------------------------
# Pure-JAX reference (same bf16-rounded trunk inputs, f32 accumulation)
# ----------------------------------------------------------------------------
def pixel_reference(x, params):
    B = x.shape[0]
    x_last = x[:, -1].reshape(B, -1).astype(jnp.bfloat16).astype(jnp.float32)
    w_trunk = params["W_trunk"].astype(jnp.bfloat16).astype(jnp.float32)
    feats = x_last @ w_trunk + params["b_trunk"]
    h = jnp.maximum(feats, 0.0) @ params["W1"] + params["b1"]
    return jnp.maximum(h, 0.0) @ params["W2"] + params["b2"]


def make_params(key, F, C):
    k1, k2, k3, k4, k5 = jax.random.split(key, 5)
    # stand-in trunk projection for resnet_3d (stored/streamed as bf16)
    W_trunk = (jax.random.normal(k1, (F, C), jnp.float32)
               * np.sqrt(2.0 / F)).astype(jnp.bfloat16)
    b_trunk = jnp.zeros((1, C), jnp.float32)
    # first_lc Linear(C, 32): PyTorch default uniform(+/- 1/sqrt(fan_in))
    lim1 = 1.0 / np.sqrt(C)
    W1 = jax.random.uniform(k2, (C, 32), jnp.float32, -lim1, lim1)
    b1 = jax.random.uniform(k3, (1, 32), jnp.float32, -lim1, lim1)
    # nlst_cat Linear(32, 2)
    lim2 = 1.0 / np.sqrt(32)
    W2 = jax.random.uniform(k4, (32, 2), jnp.float32, -lim2, lim2)
    b2 = jax.random.uniform(k5, (1, 2), jnp.float32, -lim2, lim2)
    return dict(W_trunk=W_trunk, b_trunk=b_trunk, W1=W1, b1=b1, W2=W2, b2=b2)


if __name__ == "__main__":
    B, T = 2, 8            # batch, sequence length (only the last frame is used)
    D, Hs, Ws = 4, 16, 16  # per-frame 3-D volume (single channel)
    C = 512                # trunk feature width (512 * block_expansion, expansion=1)
    F = D * Hs * Ws        # 1024

    key = jax.random.PRNGKey(0)
    kx, kp = jax.random.split(key)
    x = jax.random.normal(kx, (B, T, D, Hs, Ws), jnp.float32)
    params = make_params(kp, F, C)

    out = jax.block_until_ready(pixel_forward(x, params))
    ref = jax.block_until_ready(pixel_reference(x, params))

    assert out.shape == (B, 2)
    np.testing.assert_allclose(np.asarray(out), np.asarray(ref),
                               rtol=2e-3, atol=2e-3)
    print("KERNEL_OK")
</pallas_src>

<mosaic_0001>
module attributes {stable_mosaic.version = 11 : i64} {
  func.func @_pixel_kernel_single(%arg0: i32, %arg1: memref<2x1024xbf16, #tpu.memory_space<vmem>>, %arg2: memref<1024x512xbf16, #tpu.memory_space<vmem>>, %arg3: memref<1x512xf32, #tpu.memory_space<vmem>>, %arg4: memref<512x32xf32, #tpu.memory_space<vmem>>, %arg5: memref<1x32xf32, #tpu.memory_space<vmem>>, %arg6: memref<32x2xf32, #tpu.memory_space<vmem>>, %arg7: memref<1x2xf32, #tpu.memory_space<vmem>>, %arg8: memref<2x2xf32, #tpu.memory_space<vmem>>) attributes {dimension_semantics = [#tpu.dimension_semantics<arbitrary>], iteration_bounds = array<i64: 1>, scalar_prefetch = 0 : i64, scratch_operands = 0 : i64, tpu.core_type = #tpu.core_type<tc>, window_params = [{pipeline_mode = #tpu.pipeline_mode<synchronous>, transform_indices = @transform_0, window_bounds = array<i64: 2, 1024>}, {pipeline_mode = #tpu.pipeline_mode<synchronous>, transform_indices = @transform_1, window_bounds = array<i64: 1024, 512>}, {pipeline_mode = #tpu.pipeline_mode<synchronous>, transform_indices = @transform_2, window_bounds = array<i64: 1, 512>}, {pipeline_mode = #tpu.pipeline_mode<synchronous>, transform_indices = @transform_3, window_bounds = array<i64: 512, 32>}, {pipeline_mode = #tpu.pipeline_mode<synchronous>, transform_indices = @transform_4, window_bounds = array<i64: 1, 32>}, {pipeline_mode = #tpu.pipeline_mode<synchronous>, transform_indices = @transform_5, window_bounds = array<i64: 32, 2>}, {pipeline_mode = #tpu.pipeline_mode<synchronous>, transform_indices = @transform_6, window_bounds = array<i64: 1, 2>}, {pipeline_mode = #tpu.pipeline_mode<synchronous>, transform_indices = @transform_7, window_bounds = array<i64: 2, 2>}]} {
    %c0 = arith.constant 0 : index
    %c0_0 = arith.constant 0 : index
    %0 = vector.load %arg1[%c0, %c0_0] : memref<2x1024xbf16, #tpu.memory_space<vmem>>, vector<2x1024xbf16>
    %c0_1 = arith.constant 0 : index
    %c0_2 = arith.constant 0 : index
    %1 = vector.load %arg2[%c0_1, %c0_2] : memref<1024x512xbf16, #tpu.memory_space<vmem>>, vector<1024x512xbf16>
    %cst = arith.constant dense<0.000000e+00> : vector<2x512xf32>
    %2 = tpu.matmul %0, %1, %cst {dimension_numbers = #tpu.dot_dimension_numbers<[1], [0], [0], [1], [0, 0, 1, 1], [], []>} : vector<2x1024xbf16>, vector<1024x512xbf16>, vector<2x512xf32> -> vector<2x512xf32>
    %c0_3 = arith.constant 0 : index
    %c0_4 = arith.constant 0 : index
    %3 = vector.load %arg3[%c0_3, %c0_4] : memref<1x512xf32, #tpu.memory_space<vmem>>, vector<1x512xf32>
    %4 = vector.broadcast %3 : vector<1x512xf32> to vector<2x512xf32>
    %5 = arith.addf %2, %4 : vector<2x512xf32>
    %cst_5 = arith.constant 0.000000e+00 : f32
    %6 = vector.broadcast %cst_5 : f32 to vector<2x512xf32>
    %7 = arith.maximumf %5, %6 : vector<2x512xf32>
    %c0_6 = arith.constant 0 : index
    %c0_7 = arith.constant 0 : index
    %8 = vector.load %arg4[%c0_6, %c0_7] : memref<512x32xf32, #tpu.memory_space<vmem>>, vector<512x32xf32>
    %cst_8 = arith.constant dense<0.000000e+00> : vector<2x32xf32>
    %9 = tpu.matmul %7, %8, %cst_8 {dimension_numbers = #tpu.dot_dimension_numbers<[1], [0], [0], [1], [0, 0, 1, 1], [], []>} : vector<2x512xf32>, vector<512x32xf32>, vector<2x32xf32> -> vector<2x32xf32>
    %c0_9 = arith.constant 0 : index
    %c0_10 = arith.constant 0 : index
    %10 = vector.load %arg5[%c0_9, %c0_10] : memref<1x32xf32, #tpu.memory_space<vmem>>, vector<1x32xf32>
    %11 = vector.broadcast %10 : vector<1x32xf32> to vector<2x32xf32>
    %12 = arith.addf %9, %11 : vector<2x32xf32>
    %cst_11 = arith.constant 0.000000e+00 : f32
    %13 = vector.broadcast %cst_11 : f32 to vector<2x32xf32>
    %14 = arith.maximumf %12, %13 : vector<2x32xf32>
    %c0_12 = arith.constant 0 : index
    %c0_13 = arith.constant 0 : index
    %15 = vector.load %arg6[%c0_12, %c0_13] : memref<32x2xf32, #tpu.memory_space<vmem>>, vector<32x2xf32>
    %cst_14 = arith.constant dense<0.000000e+00> : vector<2x2xf32>
    %16 = tpu.matmul %14, %15, %cst_14 {dimension_numbers = #tpu.dot_dimension_numbers<[1], [0], [0], [1], [0, 0, 1, 1], [], []>} : vector<2x32xf32>, vector<32x2xf32>, vector<2x2xf32> -> vector<2x2xf32>
    %c0_15 = arith.constant 0 : index
    %c0_16 = arith.constant 0 : index
    %17 = vector.load %arg7[%c0_15, %c0_16] : memref<1x2xf32, #tpu.memory_space<vmem>>, vector<1x2xf32>
    %18 = vector.broadcast %17 : vector<1x2xf32> to vector<2x2xf32>
    %19 = arith.addf %16, %18 : vector<2x2xf32>
    %c0_17 = arith.constant 0 : index
    %c0_18 = arith.constant 0 : index
    %20 = vector.load %arg8[%c0_17, %c0_18] : memref<2x2xf32, #tpu.memory_space<vmem>>, vector<2x2xf32>
    tpu.vector_store %arg8[%c0_17, %c0_18], %19 {strides = array<i32>} : memref<2x2xf32, #tpu.memory_space<vmem>>, vector<2x2xf32>,
    return
  }
  func.func @transform_0(%arg0: i32) -> (i32, i32) {
    %c0_i32 = arith.constant 0 : i32
    %c0_i32_0 = arith.constant 0 : i32
    %c0_i32_1 = arith.constant 0 : i32
    return %c0_i32, %c0_i32_0 : i32, i32
  }
  func.func @transform_1(%arg0: i32) -> (i32, i32) {
    %c0_i32 = arith.constant 0 : i32
    %c0_i32_0 = arith.constant 0 : i32
    %c0_i32_1 = arith.constant 0 : i32
    return %c0_i32, %c0_i32_0 : i32, i32
  }
  func.func @transform_2(%arg0: i32) -> (i32, i32) {
    %c0_i32 = arith.constant 0 : i32
    %c0_i32_0 = arith.constant 0 : i32
    %c0_i32_1 = arith.constant 0 : i32
    return %c0_i32, %c0_i32_0 : i32, i32
  }
  func.func @transform_3(%arg0: i32) -> (i32, i32) {
    %c0_i32 = arith.constant 0 : i32
    %c0_i32_0 = arith.constant 0 : i32
    %c0_i32_1 = arith.constant 0 : i32
    return %c0_i32, %c0_i32_0 : i32, i32
  }
  func.func @transform_4(%arg0: i32) -> (i32, i32) {
    %c0_i32 = arith.constant 0 : i32
    %c0_i32_0 = arith.constant 0 : i32
    %c0_i32_1 = arith.constant 0 : i32
    return %c0_i32, %c0_i32_0 : i32, i32
  }
  func.func @transform_5(%arg0: i32) -> (i32, i32) {
    %c0_i32 = arith.constant 0 : i32
    %c0_i32_0 = arith.constant 0 : i32
    %c0_i32_1 = arith.constant 0 : i32
    return %c0_i32, %c0_i32_0 : i32, i32
  }
  func.func @transform_6(%arg0: i32) -> (i32, i32) {
    %c0_i32 = arith.constant 0 : i32
    %c0_i32_0 = arith.constant 0 : i32
    %c0_i32_1 = arith.constant 0 : i32
    return %c0_i32, %c0_i32_0 : i32, i32
  }
  func.func @transform_7(%arg0: i32) -> (i32, i32) {
    %c0_i32 = arith.constant 0 : i32
    %c0_i32_0 = arith.constant 0 : i32
    %c0_i32_1 = arith.constant 0 : i32
    return %c0_i32, %c0_i32_0 : i32, i32
  }
}

</mosaic_0001>

<bundles_post_ra>
// kernel: tpu_custom_call.1
= control target key start
LH: loop header
LB: loop body
LE: loop exit
PB: predicated region body
PF: predicated region fallthrough
CT: control target
= control target key end

     0   :  { %12 = vsyncpa [#allocation3], 0  ;;  %s3509_s0 = inlined_call_operand.vmem [shape: bf16[2,1024], index: 0, kind: input, shape index: {}]   ;;  %s3510_s1 = inlined_call_operand.hbm [shape: bf16[1024,512], index: 1, kind: input, shape index: {}]   ;;  %s3511_s2 = inlined_call_operand.vmem [shape: f32[1,512], index: 2, kind: input, shape index: {}]   ;;  %s3512_s3 = inlined_call_operand.vmem [shape: f32[512,32], index: 3, kind: input, shape index: {}]   ;;  %s3513_s4 = inlined_call_operand.vmem [shape: f32[1,32], index: 4, kind: input, shape index: {}]   ;;  %s3514_s5 = inlined_call_operand.vmem [shape: f32[32,2], index: 5, kind: input, shape index: {}]   ;;  %s3515_s6 = inlined_call_operand.vmem [shape: f32[1,2], index: 6, kind: input, shape index: {}]   ;;  %s3516_s7 = inlined_call_operand.hbm [shape: f32[2,2], index: 7, kind: output, shape index: {}]  }
   0x1   :  { %13 = vsyncpa [#allocation4], 0  ;;  %s3188_s24 = smov [#allocation2]   ;;  %s3140_s28 = scalar_lea.hbm %s3510_s1, 32768 }
   0x2   :  { %s21_s25 = sshll.u32 %s3188_s24, 4  ;;  %p3141_p0 = scmp.ne.s32.totalorder %s3510_s1, %s3140_s28  ;;  %s22_s25 = int_to_ptr.vmem [resolvable:$true] %s21_s25 }
   0x3   :  { %p3144_p1 = scmp.lt.u32.totalorder %s3140_s28, %s3510_s1 }
   0x5   :  { %p3146_p2 = pnand %p3144_p1, %p3141_p0 }
   0x7   :  { %3149 = shalt.err (!%p3146_p2)
}
   0x8   :  { %s3150_s10 = scalar_lea.vmem %s22_s25, 32768  ;;  %p3155_p4 = scmp.lt.s32.totalorder %s22_s25, %s22_s25 }
   0x9   :  { %p3151_p3 = scmp.ne.s32.totalorder %s22_s25, %s3150_s10  ;;  %p3156_p5 = scmp.lt.s32.totalorder %s3150_s10, %s3150_s10 }
   0xb   :  { %p3157_p6 = por %p3156_p5, %p3155_p4 }
   0xd   :  { %p3158_p7 = pnand %p3157_p6, %p3151_p3 }
   0xf   :  { %3161 = shalt.err (!%p3158_p7)
}
  0x10   :  { %s3189_s11 = smov 256   ;;  %s3190_s12 = smov 16  }
  0x11   :  { %27 = dma.hbm_to_vmem [thread:$0]  %s3510_s1, 32768, %s22_s25, [#allocation3], %s3189_s11, %s3189_s11, %s3190_s12  }
  0x12   :  { %3184 = dma.done.wait [#allocation3], 32768  }
  0x13   :  { %3185 = vsyncadd [#allocation3], 4294934528  ;;  %v2755_v0 = vld [vmem:[#allocation2 + $0x4] ss:$16 sps:$4 sm:$0xff]   ;;  %v2757_v1 = vld [vmem:[#allocation2 + $0xc] ss:$16 sps:$4 sm:$0xff]   ;;  %v300_v36 = vlaneseq }
  0x14   :  { %1658 = vmatprep.subr.bf16.mxu0 %v2755_v0  ;;  %v2759_v2 = vld [vmem:[#allocation2] ss:$16 sps:$4 sm:$0xff]   ;;  %v2760_v3 = vld [vmem:[#allocation2 + $0x8] ss:$16 sps:$4 sm:$0xff]   ;;  %1822 = vmatprep.subr.bf16.mxu1 %v2757_v1  ;;  %v2761_v4 = vld [vmem:[#allocation2 + $0x24] ss:$16 sps:$4 sm:$0xff]  }
  0x15   :  { %1659 = vmatpush1.bf16.msra.mxu0 %v2759_v2  ;;  %1823 = vmatpush1.bf16.msra.mxu1 %v2760_v3  ;;  %v2763_v5 = vld [vmem:[#allocation2 + $0x2c] ss:$16 sps:$4 sm:$0xff]   ;;  %v2765_v6 = vld [vmem:[#allocation2 + $0x20] ss:$16 sps:$4 sm:$0xff]   ;;  %v2766_v7 = vld [vmem:[#allocation2 + $0x28] ss:$16 sps:$4 sm:$0xff]  }
  0x16   :  { %1660 = vmatprep.subr.bf16.mxu0 %v2761_v4  ;;  %1824 = vmatprep.subr.bf16.mxu1 %v2763_v5  ;;  %v2767_v8 = vld [vmem:[#allocation2 + $0x44] ss:$16 sps:$4 sm:$0xff]   ;;  %v2769_v9 = vld [vmem:[#allocation2 + $0x4c] ss:$16 sps:$4 sm:$0xff]   ;;  %v2771_v10 = vld [vmem:[#allocation2 + $0x40] ss:$16 sps:$4 sm:$0xff]  }
  0x17   :  { %v2772_v11 = vld [vmem:[#allocation2 + $0x48] ss:$16 sps:$4 sm:$0xff]   ;;  %v2773_v12 = vld [vmem:[#allocation2 + $0x64] ss:$16 sps:$4 sm:$0xff]   ;;  %v2775_v13 = vld [vmem:[#allocation2 + $0x6c] ss:$16 sps:$4 sm:$0xff]  }
  0x18   :  { %v2777_v14 = vld [vmem:[#allocation2 + $0x60] ss:$16 sps:$4 sm:$0xff]   ;;  %v2778_v15 = vld [vmem:[#allocation2 + $0x68] ss:$16 sps:$4 sm:$0xff]   ;;  %v2779_v16 = vld [vmem:[#allocation2 + $0x84] ss:$16 sps:$4 sm:$0xff]  }
  0x19   :  { %1661 = vmatpush1.bf16.msra.mxu0 %v2765_v6  ;;  %1825 = vmatpush1.bf16.msra.mxu1 %v2766_v7  ;;  %v2781_v17 = vld [vmem:[#allocation2 + $0x8c] ss:$16 sps:$4 sm:$0xff]   ;;  %v2783_v18 = vld [vmem:[#allocation2 + $0x80] ss:$16 sps:$4 sm:$0xff]   ;;  %v2784_v19 = vld [vmem:[#allocation2 + $0x88] ss:$16 sps:$4 sm:$0xff]  }
  0x1a   :  { %1662 = vmatprep.subr.bf16.mxu0 %v2767_v8  ;;  %1826 = vmatprep.subr.bf16.mxu1 %v2769_v9  ;;  %v2785_v20 = vld [vmem:[#allocation2 + $0xa4] ss:$16 sps:$4 sm:$0xff]   ;;  %v2787_v21 = vld [vmem:[#allocation2 + $0xac] ss:$16 sps:$4 sm:$0xff]   ;;  %v2789_v22 = vld [vmem:[#allocation2 + $0xa0] ss:$16 sps:$4 sm:$0xff]  }
  0x1b   :  { %v2790_v23 = vld [vmem:[#allocation2 + $0xa8] ss:$16 sps:$4 sm:$0xff]   ;;  %v2791_v24 = vld [vmem:[#allocation2 + $0xc4] ss:$16 sps:$4 sm:$0xff]   ;;  %v2793_v25 = vld [vmem:[#allocation2 + $0xcc] ss:$16 sps:$4 sm:$0xff]  }
  0x1c   :  { %v2795_v26 = vld [vmem:[#allocation2 + $0xc0] ss:$16 sps:$4 sm:$0xff]   ;;  %v2796_v27 = vld [vmem:[#allocation2 + $0xc8] ss:$16 sps:$4 sm:$0xff]   ;;  %v2797_v28 = vld [vmem:[#allocation2 + $0xe4] ss:$16 sps:$4 sm:$0xff]  }
  0x1d   :  { %1663 = vmatpush1.bf16.msra.mxu0 %v2771_v10  ;;  %1827 = vmatpush1.bf16.msra.mxu1 %v2772_v11  ;;  %v2799_v29 = vld [vmem:[#allocation2 + $0xec] ss:$16 sps:$4 sm:$0xff]   ;;  %v2801_v30 = vld [vmem:[#allocation2 + $0xe0] ss:$16 sps:$4 sm:$0xff]   ;;  %v2802_v31 = vld [vmem:[#allocation2 + $0xe8] ss:$16 sps:$4 sm:$0xff]  }
  0x1e   :  { %1664 = vmatprep.subr.bf16.mxu0 %v2773_v12  ;;  %1828 = vmatprep.subr.bf16.mxu1 %v2775_v13  ;;  %v2803_v32 = vld [vmem:[#allocation2 + $0x104] ss:$16 sps:$4 sm:$0xff]   ;;  %v2805_v33 = vld [vmem:[#allocation2 + $0x10c] ss:$16 sps:$4 sm:$0xff]   ;;  %v2807_v34 = vld [vmem:[#allocation2 + $0x100] ss:$16 sps:$4 sm:$0xff]  }
  0x1f   :  { %v2808_v35 = vld [vmem:[#allocation2 + $0x108] ss:$16 sps:$4 sm:$0xff]   ;;  %v3191_v37 = vmov 1966171168   ;;  %v2809_v39 = vld [vmem:[#allocation2 + $0x124] ss:$16 sps:$4 sm:$0xff]  }
  0x20   :  { %v323_v38 = vunpack.c.l.s4 %v3191_v37  ;;  %v2811_v40 = vld [vmem:[#allocation2 + $0x12c] ss:$16 sps:$4 sm:$0xff]   ;;  %v2813_v41 = vld [vmem:[#allocation2 + $0x120] ss:$16 sps:$4 sm:$0xff]   ;;  %v3248_v42 = vshrl.u32 %v300_v36, 7  ;;  %vm3193_vm0 = vmmov 0  }
  0x21   :  { %1665 = vmatpush1.bf16.msra.mxu0 %v2777_v14  ;;  %1829 = vmatpush1.bf16.msra.mxu1 %v2778_v15  ;;  %v2814_v44 = vld [vmem:[#allocation2 + $0x128] ss:$16 sps:$4 sm:$0xff]   ;;  %v2815_v45 = vld [vmem:[#allocation2 + $0x144] ss:$16 sps:$4 sm:$0xff]   ;;  %v2817_v46 = vld [vmem:[#allocation2 + $0x14c] ss:$16 sps:$4 sm:$0xff]  }
  0x22   :  { %1666 = vmatprep.subr.bf16.mxu0 %v2779_v16  ;;  %1830 = vmatprep.subr.bf16.mxu1 %v2781_v17  ;;  %v324_v43 = vunpack.c.0.s8 %v323_v38  ;;  %v2819_v47 = vld [vmem:[#allocation2 + $0x140] ss:$16 sps:$4 sm:$0xff]   ;;  %v2820_v48 = vld [vmem:[#allocation2 + $0x148] ss:$16 sps:$4 sm:$0xff]   ;;  %v2821_v50 = vld [vmem:[#allocation2 + $0x164] ss:$16 sps:$4 sm:$0xff]  }
  0x23   :  { %v2823_v51 = vld [vmem:[#allocation2 + $0x16c] ss:$16 sps:$4 sm:$0xff]   ;;  %v41_v52 = vld [vmem:[%s3509_s0] sm:$0xff]  ;;  %v2826_v55 = vld [vmem:[#allocation2 + $0x168] ss:$16 sps:$4 sm:$0xff]   ;;  %vm2213_vm1 = vcmask 261120  }
  0x24   :  { %v3251_v49 = vsub.s32 %v324_v43, %v3248_v42  ;;  %v2825_v53 = vld [vmem:[#allocation2 + $0x160] ss:$16 sps:$4 sm:$0xff]   ;;  %v2827_v56 = vld [vmem:[#allocation2 + $0x184] ss:$16 sps:$4 sm:$0xff]   ;;  %v2829_v57 = vld [vmem:[#allocation2 + $0x18c] ss:$16 sps:$4 sm:$0xff]   ;;  %v321_v9 = vcombine.high %v41_v52, %v41_v52 }
  0x25   :  { %1667 = vmatpush1.bf16.msra.mxu0 %v2783_v18  ;;  %1831 = vmatpush1.bf16.msra.mxu1 %v2784_v19  ;;  %v2831_v59 = vld [vmem:[#allocation2 + $0x180] ss:$16 sps:$4 sm:$0xff]   ;;  %v2832_v61 = vld [vmem:[#allocation2 + $0x188] ss:$16 sps:$4 sm:$0xff]   ;;  %v2833_v62 = vld [vmem:[#allocation2 + $0x1a4] ss:$16 sps:$4 sm:$0xff]  }
  0x26   :  { %1668 = vmatprep.subr.bf16.mxu0 %v2785_v20  ;;  %1832 = vmatprep.subr.bf16.mxu1 %v2787_v21  ;;  %v328_v54 = vrot.slane %v41_v52, %v3251_v49  ;;  %v2835_v63 = vld [vmem:[#allocation2 + $0x1ac] ss:$16 sps:$4 sm:$0xff]   ;;  %v2837_v0 = vld [vmem:[#allocation2 + $0x1a0] ss:$16 sps:$4 sm:$0xff]   ;;  %v2838_v1 = vld [vmem:[#allocation2 + $0x1a8] ss:$16 sps:$4 sm:$0xff]   ;;  %v335_v13 = vrot.slane %v321_v9, %v3251_v49 }
  0x27   :  { %v2839_v2 = vld [vmem:[#allocation2 + $0x1c4] ss:$16 sps:$4 sm:$0xff]   ;;  %v2841_v3 = vld [vmem:[#allocation2 + $0x1cc] ss:$16 sps:$4 sm:$0xff]   ;;  %v2843_v4 = vld [vmem:[#allocation2 + $0x1c0] ss:$16 sps:$4 sm:$0xff]  }
  0x28   :  { %v336_v58 = vcombine.high %v328_v54, %v328_v54  ;;  %v2844_v5 = vld [vmem:[#allocation2 + $0x1c8] ss:$16 sps:$4 sm:$0xff]   ;;  %v2845_v6 = vld [vmem:[#allocation2 + $0x1e4] ss:$16 sps:$4 sm:$0xff]   ;;  %v2847_v7 = vld [vmem:[#allocation2 + $0x1ec] ss:$16 sps:$4 sm:$0xff]   ;;  %v3260_v15 = vrot.slane %v328_v54, %v3251_v49  ;;  %v337_v16 = vcombine.high %v335_v13, %v335_v13  ;;  %v3266_v21 = vrot.slane %v335_v13, %v3251_v49 }
  0x29   :  { %1669 = vmatpush1.bf16.msra.mxu0 %v2789_v22  ;;  %1833 = vmatpush1.bf16.msra.mxu1 %v2790_v23  ;;  %v2849_v8 = vld [vmem:[#allocation2 + $0x1e0] ss:$16 sps:$4 sm:$0xff]   ;;  %v2850_v10 = vld [vmem:[#allocation2 + $0x1e8] ss:$16 sps:$4 sm:$0xff]   ;;  %v2853_v11 = vld [vmem:[#allocation2 + $0x204] ss:$16 sps:$4 sm:$0xff]  }
  0x2a   :  { %1670 = vmatprep.subr.bf16.mxu0 %v2791_v24  ;;  %1834 = vmatprep.subr.bf16.mxu1 %v2793_v25  ;;  %v358_v60 = vrot.slane %v336_v58, %v3251_v49  ;;  %v2856_v12 = vld [vmem:[#allocation2 + $0x20c] ss:$16 sps:$4 sm:$0xff]   ;;  %v2851_v14 = vld [vmem:[#allocation2 + $0x200] ss:$16 sps:$4 sm:$0xff]   ;;  %v2854_v17 = vld [vmem:[#allocation2 + $0x208] ss:$16 sps:$4 sm:$0xff]   ;;  %v3263_v20 = vrot.slane %v337_v16, %v3251_v49 }
  0x2b   :  { %v2859_v18 = vld [vmem:[#allocation2 + $0x224] ss:$16 sps:$4 sm:$0xff]   ;;  %v2862_v19 = vld [vmem:[#allocation2 + $0x22c] ss:$16 sps:$4 sm:$0xff]   ;;  %v2857_v23 = vld [vmem:[#allocation2 + $0x220] ss:$16 sps:$4 sm:$0xff]  }
  0x2c   :  { %1690 = vmatprep.mubr.bf16.mxu0 %v358_v60  ;;  %1854 = vmatprep.mubr.bf16.mxu1 %v358_v60  ;;  %v368_v22 = vcombine.high %v358_v60, %v358_v60  ;;  %v2860_v24 = vld [vmem:[#allocation2 + $0x228] ss:$16 sps:$4 sm:$0xff]   ;;  %v2865_v25 = vld [vmem:[#allocation2 + $0x244] ss:$16 sps:$4 sm:$0xff]   ;;  %v2886_v38 = vld [vmem:[#allocation2 + $0x2ac] ss:$16 sps:$4 sm:$0xff]  }
  0x2d   :  { %1671 = vmatpush1.bf16.msra.mxu0 %v2795_v26  ;;  %1835 = vmatpush1.bf16.msra.mxu1 %v2796_v27  ;;  %v2868_v26 = vld [vmem:[#allocation2 + $0x24c] ss:$16 sps:$4 sm:$0xff]   ;;  %v2863_v27 = vld [vmem:[#allocation2 + $0x240] ss:$16 sps:$4 sm:$0xff]   ;;  %v2878_v36 = vld [vmem:[#allocation2 + $0x288] ss:$16 sps:$4 sm:$0xff]  }
  0x2e   :  { %1672 = vmatprep.subr.bf16.mxu0 %v2797_v28  ;;  %1836 = vmatprep.subr.bf16.mxu1 %v2799_v29  ;;  %v2866_v28 = vld [vmem:[#allocation2 + $0x248] ss:$16 sps:$4 sm:$0xff]   ;;  %v2871_v29 = vld [vmem:[#allocation2 + $0x264] ss:$16 sps:$4 sm:$0xff]   ;;  %v2892_v43 = vld [vmem:[#allocation2 + $0x2cc] ss:$16 sps:$4 sm:$0xff]  }
  0x2f   :  { %v2883_v37 = vld [vmem:[#allocation2 + $0x2a4] ss:$16 sps:$4 sm:$0xff]   ;;  %v2896_v49 = vld [vmem:[#allocation2 + $0x2e8] ss:$16 sps:$4 sm:$0xff]   ;;  %v2899_v52 = vld [vmem:[#allocation2 + $0x300] ss:$16 sps:$4 sm:$0xff]  }
  0x30   :  { %v2907_v54 = vld [vmem:[#allocation2 + $0x324] ss:$16 sps:$4 sm:$0xff]   ;;  %v2911_v60 = vld [vmem:[#allocation2 + $0x340] ss:$16 sps:$4 sm:$0xff]   ;;  %v2932_v9 = vld [vmem:[#allocation2 + $0x3a8] ss:$16 sps:$4 sm:$0xff]  }
  0x31   :  { %1673 = vmatpush1.bf16.msra.mxu0 %v2801_v30  ;;  %1837 = vmatpush1.bf16.msra.mxu1 %v2802_v31  ;;  %v2874_v30 = vld [vmem:[#allocation2 + $0x26c] ss:$16 sps:$4 sm:$0xff]   ;;  %v2869_v31 = vld [vmem:[#allocation2 + $0x260] ss:$16 sps:$4 sm:$0xff]   ;;  %v2913_v58 = vld [vmem:[#allocation2 + $0x344] ss:$16 sps:$4 sm:$0xff]  }
  0x32   :  { %1674 = vmatprep.subr.bf16.mxu0 %v2803_v32  ;;  %1838 = vmatprep.subr.bf16.mxu1 %v2805_v33  ;;  %v2872_v32 = vld [vmem:[#allocation2 + $0x268] ss:$16 sps:$4 sm:$0xff]   ;;  %v2877_v33 = vld [vmem:[#allocation2 + $0x284] ss:$16 sps:$4 sm:$0xff]   ;;  %v2946_v16 = vld [vmem:[#allocation2 + $0x3ec] ss:$16 sps:$4 sm:$0xff]  }
  0x33   :  { %v2938_v13 = vld [vmem:[#allocation2 + $0x3c8] ss:$16 sps:$4 sm:$0xff]   ;;  %s3195_s29 = smov [#allocation5]   ;;  %vm2287_vm2 = vcmask 9216  }
  0x34   :  { %s2295_s30 = sshll.u32 %s3195_s29, 4  ;;  %s2296_s30 = int_to_ptr.vmem [resolvable:$true] %s2295_s30 }
  0x35   :  { %1675 = vmatpush1.bf16.msra.mxu0 %v2807_v34  ;;  %1839 = vmatpush1.bf16.msra.mxu1 %v2808_v35  ;;  %v2880_v34 = vld [vmem:[#allocation2 + $0x28c] ss:$16 sps:$4 sm:$0xff]   ;;  %v2875_v35 = vld [vmem:[#allocation2 + $0x280] ss:$16 sps:$4 sm:$0xff]   ;;  %p3167_p9 = scmp.lt.s32.totalorder %s2296_s30, %s2296_s30 }
  0x36   :  { %1676 = vmatprep.subr.bf16.mxu0 %v2809_v39  ;;  %1840 = vmatprep.subr.bf16.mxu1 %v2811_v40  ;;  %v2881_v39 = vld [vmem:[#allocation2 + $0x2a0] ss:$16 sps:$4 sm:$0xff]   ;;  %v2884_v40 = vld [vmem:[#allocation2 + $0x2a8] ss:$16 sps:$4 sm:$0xff]  }
  0x39   :  { %1677 = vmatpush1.bf16.msra.mxu0 %v2813_v41  ;;  %1841 = vmatpush1.bf16.msra.mxu1 %v2814_v44  ;;  %v2889_v41 = vld [vmem:[#allocation2 + $0x2c4] ss:$16 sps:$4 sm:$0xff]   ;;  %v2887_v44 = vld [vmem:[#allocation2 + $0x2c0] ss:$16 sps:$4 sm:$0xff]  }
  0x3a   :  { %1678 = vmatprep.subr.bf16.mxu0 %v2815_v45  ;;  %1842 = vmatprep.subr.bf16.mxu1 %v2817_v46  ;;  %v2890_v45 = vld [vmem:[#allocation2 + $0x2c8] ss:$16 sps:$4 sm:$0xff]   ;;  %v2895_v46 = vld [vmem:[#allocation2 + $0x2e4] ss:$16 sps:$4 sm:$0xff]  }
  0x3d   :  { %1679 = vmatpush1.bf16.msra.mxu0 %v2819_v47  ;;  %1843 = vmatpush1.bf16.msra.mxu1 %v2820_v48  ;;  %v2898_v47 = vld [vmem:[#allocation2 + $0x2ec] ss:$16 sps:$4 sm:$0xff]   ;;  %v2893_v48 = vld [vmem:[#allocation2 + $0x2e0] ss:$16 sps:$4 sm:$0xff]  }
  0x3e   :  { %1680 = vmatprep.subr.bf16.mxu0 %v2821_v50  ;;  %1844 = vmatprep.subr.bf16.mxu1 %v2823_v51  ;;  %v2901_v50 = vld [vmem:[#allocation2 + $0x304] ss:$16 sps:$4 sm:$0xff]   ;;  %v2904_v51 = vld [vmem:[#allocation2 + $0x30c] ss:$16 sps:$4 sm:$0xff]  }
  0x41   :  { %1681 = vmatpush1.bf16.msra.mxu0 %v2825_v53  ;;  %1845 = vmatpush1.bf16.msra.mxu1 %v2826_v55  ;;  %v2902_v53 = vld [vmem:[#allocation2 + $0x308] ss:$16 sps:$4 sm:$0xff]   ;;  %v2910_v55 = vld [vmem:[#allocation2 + $0x32c] ss:$16 sps:$4 sm:$0xff]  }
  0x42   :  { %1682 = vmatprep.subr.bf16.mxu0 %v2827_v56  ;;  %1846 = vmatprep.subr.bf16.mxu1 %v2829_v57  ;;  %v2905_v56 = vld [vmem:[#allocation2 + $0x320] ss:$16 sps:$4 sm:$0xff]   ;;  %v2908_v57 = vld [vmem:[#allocation2 + $0x328] ss:$16 sps:$4 sm:$0xff]  }
  0x45   :  { %1683 = vmatpush1.bf16.msra.mxu0 %v2831_v59  ;;  %1847 = vmatpush1.bf16.msra.mxu1 %v2832_v61  ;;  %v2916_v59 = vld [vmem:[#allocation2 + $0x34c] ss:$16 sps:$4 sm:$0xff]   ;;  %v2914_v61 = vld [vmem:[#allocation2 + $0x348] ss:$16 sps:$4 sm:$0xff]  }
  0x46   :  { %1684 = vmatprep.subr.bf16.mxu0 %v2833_v62  ;;  %1848 = vmatprep.subr.bf16.mxu1 %v2835_v63  ;;  %v2919_v62 = vld [vmem:[#allocation2 + $0x364] ss:$16 sps:$4 sm:$0xff]   ;;  %v2922_v63 = vld [vmem:[#allocation2 + $0x36c] ss:$16 sps:$4 sm:$0xff]  }
  0x49   :  { %1685 = vmatpush1.bf16.msra.mxu0 %v2837_v0  ;;  %1849 = vmatpush1.bf16.msra.mxu1 %v2838_v1  ;;  %v2917_v0 = vld [vmem:[#allocation2 + $0x360] ss:$16 sps:$4 sm:$0xff]   ;;  %v2920_v1 = vld [vmem:[#allocation2 + $0x368] ss:$16 sps:$4 sm:$0xff]  }
  0x4a   :  { %1686 = vmatprep.subr.bf16.mxu0 %v2839_v2  ;;  %1850 = vmatprep.subr.bf16.mxu1 %v2841_v3  ;;  %v2925_v2 = vld [vmem:[#allocation2 + $0x384] ss:$16 sps:$4 sm:$0xff]   ;;  %v2928_v3 = vld [vmem:[#allocation2 + $0x38c] ss:$16 sps:$4 sm:$0xff]  }
  0x4d   :  { %1687 = vmatpush1.bf16.msra.mxu0 %v2843_v4  ;;  %1851 = vmatpush1.bf16.msra.mxu1 %v2844_v5  ;;  %v2923_v4 = vld [vmem:[#allocation2 + $0x380] ss:$16 sps:$4 sm:$0xff]   ;;  %v2926_v5 = vld [vmem:[#allocation2 + $0x388] ss:$16 sps:$4 sm:$0xff]  }
  0x4e   :  { %1688 = vmatprep.subr.bf16.mxu0 %v2845_v6  ;;  %1852 = vmatprep.subr.bf16.mxu1 %v2847_v7  ;;  %v2931_v6 = vld [vmem:[#allocation2 + $0x3a4] ss:$16 sps:$4 sm:$0xff]   ;;  %v2934_v7 = vld [vmem:[#allocation2 + $0x3ac] ss:$16 sps:$4 sm:$0xff]  }
  0x51   :  { %1689 = vmatpush1.bf16.msra.mxu0 %v2849_v8  ;;  %1853 = vmatpush1.bf16.msra.mxu1 %v2850_v10  ;;  %v2929_v8 = vld [vmem:[#allocation2 + $0x3a0] ss:$16 sps:$4 sm:$0xff]   ;;  %v2937_v10 = vld [vmem:[#allocation2 + $0x3c4] ss:$16 sps:$4 sm:$0xff]  }
  0x52   :  { %1699 = vmatprep.subr.bf16.mxu0 %v2853_v11  ;;  %1863 = vmatprep.subr.bf16.mxu1 %v2856_v12  ;;  %v2940_v11 = vld [vmem:[#allocation2 + $0x3cc] ss:$16 sps:$4 sm:$0xff]   ;;  %v2935_v12 = vld [vmem:[#allocation2 + $0x3c0] ss:$16 sps:$4 sm:$0xff]  }
  0x54   :  { %1691 = vmatmul.mubr.bf16.vlgmr.msra.gmra.mrb[0].mxu0 %v3260_v15  ;;  %1855 = vmatmul.mubr.bf16.vlgmr.msra.gmra.mrb[0].mxu1 %v3260_v15 }
  0x55   :  { %1700 = vmatpush1.bf16.msra.mxu0 %v2851_v14  ;;  %1864 = vmatpush1.bf16.msra.mxu1 %v2854_v17  ;;  %v2943_v14 = vld [vmem:[#allocation2 + $0x3e4] ss:$16 sps:$4 sm:$0xff]   ;;  %v2941_v17 = vld [vmem:[#allocation2 + $0x3e0] ss:$16 sps:$4 sm:$0xff]  }
  0x56   :  { %1701 = vmatprep.subr.bf16.mxu0 %v2859_v18  ;;  %1865 = vmatprep.subr.bf16.mxu1 %v2862_v19  ;;  %v2944_v18 = vld [vmem:[#allocation2 + $0x3e8] ss:$16 sps:$4 sm:$0xff]   ;;  %v2949_v19 = vld [vmem:[#allocation2 + $0x404] ss:$16 sps:$4 sm:$0xff]  }
  0x57   :  { %1731 = vmatprep.mubr.bf16.mxu0 %v368_v22  ;;  %1895 = vmatprep.mubr.bf16.mxu1 %v368_v22  ;;  %v2952_v22 = vld [vmem:[#allocation2 + $0x40c] ss:$16 sps:$4 sm:$0xff]  }
  0x59   :  { %1702 = vmatpush1.bf16.msra.mxu0 %v2857_v23  ;;  %1866 = vmatpush1.bf16.msra.mxu1 %v2860_v24  ;;  %v2947_v23 = vld [vmem:[#allocation2 + $0x400] ss:$16 sps:$4 sm:$0xff]   ;;  %v366_v24 = vcombine.high %v3260_v15, %v3260_v15 }
  0x5a   :  { %1703 = vmatprep.subr.bf16.mxu0 %v2865_v25  ;;  %1867 = vmatprep.subr.bf16.mxu1 %v2868_v26  ;;  %v2950_v25 = vld [vmem:[#allocation2 + $0x408] ss:$16 sps:$4 sm:$0xff]   ;;  %v2955_v26 = vld [vmem:[#allocation2 + $0x424] ss:$16 sps:$4 sm:$0xff]   ;;  %v2959_v15 = vld [vmem:[#allocation2 + $0x440] ss:$16 sps:$4 sm:$0xff]  }
  0x5d   :  { %1704 = vmatpush1.bf16.msra.mxu0 %v2863_v27  ;;  %1868 = vmatpush1.bf16.msra.mxu1 %v2866_v28  ;;  %v2958_v27 = vld [vmem:[#allocation2 + $0x42c] ss:$16 sps:$4 sm:$0xff]   ;;  %v2953_v28 = vld [vmem:[#allocation2 + $0x420] ss:$16 sps:$4 sm:$0xff]  }
  0x5e   :  { %1705 = vmatprep.subr.bf16.mxu0 %v2871_v29  ;;  %1869 = vmatprep.subr.bf16.mxu1 %v2874_v30  ;;  %v2956_v29 = vld [vmem:[#allocation2 + $0x428] ss:$16 sps:$4 sm:$0xff]   ;;  %v2961_v30 = vld [vmem:[#allocation2 + $0x444] ss:$16 sps:$4 sm:$0xff]  }
  0x61   :  { %1706 = vmatpush1.bf16.msra.mxu0 %v2869_v31  ;;  %1870 = vmatpush1.bf16.msra.mxu1 %v2872_v32  ;;  %v2964_v31 = vld [vmem:[#allocation2 + $0x44c] ss:$16 sps:$4 sm:$0xff]   ;;  %v2962_v32 = vld [vmem:[#allocation2 + $0x448] ss:$16 sps:$4 sm:$0xff]  }
  0x62   :  { %1707 = vmatprep.subr.bf16.mxu0 %v2877_v33  ;;  %1871 = vmatprep.subr.bf16.mxu1 %v2880_v34  ;;  %v2967_v33 = vld [vmem:[#allocation2 + $0x464] ss:$16 sps:$4 sm:$0xff]   ;;  %v2970_v34 = vld [vmem:[#allocation2 + $0x46c] ss:$16 sps:$4 sm:$0xff]  }
  0x65   :  { %1708 = vmatpush1.bf16.msra.mxu0 %v2875_v35  ;;  %1872 = vmatpush1.bf16.msra.mxu1 %v2878_v36  ;;  %v2965_v35 = vld [vmem:[#allocation2 + $0x460] ss:$16 sps:$4 sm:$0xff]   ;;  %v2968_v36 = vld [vmem:[#allocation2 + $0x468] ss:$16 sps:$4 sm:$0xff]  }
  0x66   :  { %1709 = vmatprep.subr.bf16.mxu0 %v2883_v37  ;;  %1873 = vmatprep.subr.bf16.mxu1 %v2886_v38  ;;  %v2973_v37 = vld [vmem:[#allocation2 + $0x484] ss:$16 sps:$4 sm:$0xff]   ;;  %v2976_v38 = vld [vmem:[#allocation2 + $0x48c] ss:$16 sps:$4 sm:$0xff]  }
  0x69   :  { %1710 = vmatpush1.bf16.msra.mxu0 %v2881_v39  ;;  %1874 = vmatpush1.bf16.msra.mxu1 %v2884_v40  ;;  %v2971_v39 = vld [vmem:[#allocation2 + $0x480] ss:$16 sps:$4 sm:$0xff]   ;;  %v2974_v40 = vld [vmem:[#allocation2 + $0x488] ss:$16 sps:$4 sm:$0xff]  }
  0x6a   :  { %1711 = vmatprep.subr.bf16.mxu0 %v2889_v41  ;;  %1875 = vmatprep.subr.bf16.mxu1 %v2892_v43  ;;  %v2979_v41 = vld [vmem:[#allocation2 + $0x4a4] ss:$16 sps:$4 sm:$0xff]   ;;  %v2982_v43 = vld [vmem:[#allocation2 + $0x4ac] ss:$16 sps:$4 sm:$0xff]  }
  0x6d   :  { %1712 = vmatpush1.bf16.msra.mxu0 %v2887_v44  ;;  %1876 = vmatpush1.bf16.msra.mxu1 %v2890_v45  ;;  %v2977_v44 = vld [vmem:[#allocation2 + $0x4a0] ss:$16 sps:$4 sm:$0xff]   ;;  %v2980_v45 = vld [vmem:[#allocation2 + $0x4a8] ss:$16 sps:$4 sm:$0xff]  }
  0x6e   :  { %1713 = vmatprep.subr.bf16.mxu0 %v2895_v46  ;;  %1877 = vmatprep.subr.bf16.mxu1 %v2898_v47  ;;  %v2985_v46 = vld [vmem:[#allocation2 + $0x4c4] ss:$16 sps:$4 sm:$0xff]   ;;  %v2988_v47 = vld [vmem:[#allocation2 + $0x4cc] ss:$16 sps:$4 sm:$0xff]  }
  0x71   :  { %1714 = vmatpush1.bf16.msra.mxu0 %v2893_v48  ;;  %1878 = vmatpush1.bf16.msra.mxu1 %v2896_v49  ;;  %v2983_v48 = vld [vmem:[#allocation2 + $0x4c0] ss:$16 sps:$4 sm:$0xff]   ;;  %v2986_v49 = vld [vmem:[#allocation2 + $0x4c8] ss:$16 sps:$4 sm:$0xff]  }
  0x72   :  { %1715 = vmatprep.subr.bf16.mxu0 %v2901_v50  ;;  %1879 = vmatprep.subr.bf16.mxu1 %v2904_v51  ;;  %v2991_v50 = vld [vmem:[#allocation2 + $0x4e4] ss:$16 sps:$4 sm:$0xff]   ;;  %v2994_v51 = vld [vmem:[#allocation2 + $0x4ec] ss:$16 sps:$4 sm:$0xff]  }
  0x75   :  { %1716 = vmatpush1.bf16.msra.mxu0 %v2899_v52  ;;  %1880 = vmatpush1.bf16.msra.mxu1 %v2902_v53  ;;  %v2989_v52 = vld [vmem:[#allocation2 + $0x4e0] ss:$16 sps:$4 sm:$0xff]   ;;  %v2992_v53 = vld [vmem:[#allocation2 + $0x4e8] ss:$16 sps:$4 sm:$0xff]  }
  0x76   :  { %1717 = vmatprep.subr.bf16.mxu0 %v2907_v54  ;;  %1881 = vmatprep.subr.bf16.mxu1 %v2910_v55  ;;  %v2997_v54 = vld [vmem:[#allocation2 + $0x504] ss:$16 sps:$4 sm:$0xff]   ;;  %v3000_v55 = vld [vmem:[#allocation2 + $0x50c] ss:$16 sps:$4 sm:$0xff]  }
  0x79   :  { %1718 = vmatpush1.bf16.msra.mxu0 %v2905_v56  ;;  %1882 = vmatpush1.bf16.msra.mxu1 %v2908_v57  ;;  %v2995_v56 = vld [vmem:[#allocation2 + $0x500] ss:$16 sps:$4 sm:$0xff]   ;;  %v2998_v57 = vld [vmem:[#allocation2 + $0x508] ss:$16 sps:$4 sm:$0xff]  }
  0x7a   :  { %1719 = vmatprep.subr.bf16.mxu0 %v2913_v58  ;;  %1883 = vmatprep.subr.bf16.mxu1 %v2916_v59  ;;  %v3003_v58 = vld [vmem:[#allocation2 + $0x524] ss:$16 sps:$4 sm:$0xff]   ;;  %v3006_v59 = vld [vmem:[#allocation2 + $0x52c] ss:$16 sps:$4 sm:$0xff]  }
  0x7d   :  { %1720 = vmatpush1.bf16.msra.mxu0 %v2911_v60  ;;  %1884 = vmatpush1.bf16.msra.mxu1 %v2914_v61  ;;  %v3001_v60 = vld [vmem:[#allocation2 + $0x520] ss:$16 sps:$4 sm:$0xff]   ;;  %v3004_v61 = vld [vmem:[#allocation2 + $0x528] ss:$16 sps:$4 sm:$0xff]  }
  0x7e   :  { %1721 = vmatprep.subr.bf16.mxu0 %v2919_v62  ;;  %1885 = vmatprep.subr.bf16.mxu1 %v2922_v63  ;;  %v3009_v62 = vld [vmem:[#allocation2 + $0x544] ss:$16 sps:$4 sm:$0xff]   ;;  %v3012_v63 = vld [vmem:[#allocation2 + $0x54c] ss:$16 sps:$4 sm:$0xff]  }
  0x81   :  { %1722 = vmatpush1.bf16.msra.mxu0 %v2917_v0  ;;  %1886 = vmatpush1.bf16.msra.mxu1 %v2920_v1  ;;  %v3007_v0 = vld [vmem:[#allocation2 + $0x540] ss:$16 sps:$4 sm:$0xff]   ;;  %v3010_v1 = vld [vmem:[#allocation2 + $0x548] ss:$16 sps:$4 sm:$0xff]  }
  0x82   :  { %1723 = vmatprep.subr.bf16.mxu0 %v2925_v2  ;;  %1887 = vmatprep.subr.bf16.mxu1 %v2928_v3  ;;  %v3015_v2 = vld [vmem:[#allocation2 + $0x564] ss:$16 sps:$4 sm:$0xff]   ;;  %v3018_v3 = vld [vmem:[#allocation2 + $0x56c] ss:$16 sps:$4 sm:$0xff]  }
  0x85   :  { %1724 = vmatpush1.bf16.msra.mxu0 %v2923_v4  ;;  %1888 = vmatpush1.bf16.msra.mxu1 %v2926_v5  ;;  %v3013_v4 = vld [vmem:[#allocation2 + $0x560] ss:$16 sps:$4 sm:$0xff]   ;;  %v3016_v5 = vld [vmem:[#allocation2 + $0x568] ss:$16 sps:$4 sm:$0xff]  }
  0x86   :  { %1725 = vmatprep.subr.bf16.mxu0 %v2931_v6  ;;  %1889 = vmatprep.subr.bf16.mxu1 %v2934_v7  ;;  %v3021_v6 = vld [vmem:[#allocation2 + $0x584] ss:$16 sps:$4 sm:$0xff]   ;;  %v3024_v7 = vld [vmem:[#allocation2 + $0x58c] ss:$16 sps:$4 sm:$0xff]  }
  0x89   :  { %1726 = vmatpush1.bf16.msra.mxu0 %v2929_v8  ;;  %1890 = vmatpush1.bf16.msra.mxu1 %v2932_v9  ;;  %v3019_v8 = vld [vmem:[#allocation2 + $0x580] ss:$16 sps:$4 sm:$0xff]   ;;  %v3022_v9 = vld [vmem:[#allocation2 + $0x588] ss:$16 sps:$4 sm:$0xff]  }
  0x8a   :  { %1727 = vmatprep.subr.bf16.mxu0 %v2937_v10  ;;  %1891 = vmatprep.subr.bf16.mxu1 %v2940_v11  ;;  %v3027_v10 = vld [vmem:[#allocation2 + $0x5a4] ss:$16 sps:$4 sm:$0xff]   ;;  %v3030_v11 = vld [vmem:[#allocation2 + $0x5ac] ss:$16 sps:$4 sm:$0xff]  }
  0x8d   :  { %1728 = vmatpush1.bf16.msra.mxu0 %v2935_v12  ;;  %1892 = vmatpush1.bf16.msra.mxu1 %v2938_v13  ;;  %v3025_v12 = vld [vmem:[#allocation2 + $0x5a0] ss:$16 sps:$4 sm:$0xff]   ;;  %v3028_v13 = vld [vmem:[#allocation2 + $0x5a8] ss:$16 sps:$4 sm:$0xff]  }
  0x8e   :  { %1729 = vmatprep.subr.bf16.mxu0 %v2943_v14  ;;  %1893 = vmatprep.subr.bf16.mxu1 %v2946_v16  ;;  %v3033_v14 = vld [vmem:[#allocation2 + $0x5c4] ss:$16 sps:$4 sm:$0xff]   ;;  %v3036_v16 = vld [vmem:[#allocation2 + $0x5cc] ss:$16 sps:$4 sm:$0xff]  }
  0x91   :  { %1730 = vmatpush1.bf16.msra.mxu0 %v2941_v17  ;;  %1894 = vmatpush1.bf16.msra.mxu1 %v2944_v18  ;;  %v3031_v17 = vld [vmem:[#allocation2 + $0x5c0] ss:$16 sps:$4 sm:$0xff]   ;;  %v3034_v18 = vld [vmem:[#allocation2 + $0x5c8] ss:$16 sps:$4 sm:$0xff]  }
  0x92   :  { %1740 = vmatprep.subr.bf16.mxu0 %v2949_v19  ;;  %1904 = vmatprep.subr.bf16.mxu1 %v2952_v22  ;;  %v3039_v19 = vld [vmem:[#allocation2 + $0x5e4] ss:$16 sps:$4 sm:$0xff]   ;;  %v3042_v22 = vld [vmem:[#allocation2 + $0x5ec] ss:$16 sps:$4 sm:$0xff]  }
  0x94   :  { %1732 = vmatmul.mubr.bf16.vlgmr.msra.gmra.mrb[0].mxu0 %v366_v24  ;;  %1896 = vmatmul.mubr.bf16.vlgmr.msra.gmra.mrb[0].mxu1 %v366_v24  ;;  %v3040_v24 = vld [vmem:[#allocation2 + $0x5e8] ss:$16 sps:$4 sm:$0xff]  }
  0x95   :  { %1741 = vmatpush1.bf16.msra.mxu0 %v2947_v23  ;;  %1905 = vmatpush1.bf16.msra.mxu1 %v2950_v25  ;;  %v3037_v23 = vld [vmem:[#allocation2 + $0x5e0] ss:$16 sps:$4 sm:$0xff]   ;;  %v3046_v25 = vld [vmem:[#allocation2 + $0x604] ss:$16 sps:$4 sm:$0xff]  }
  0x96   :  { %1742 = vmatprep.subr.bf16.mxu0 %v2955_v26  ;;  %1906 = vmatprep.subr.bf16.mxu1 %v2958_v27  ;;  %v3049_v26 = vld [vmem:[#allocation2 + $0x60c] ss:$16 sps:$4 sm:$0xff]   ;;  %v3044_v27 = vld [vmem:[#allocation2 + $0x600] ss:$16 sps:$4 sm:$0xff]  }
  0x97   :  { %1772 = vmatprep.mubr.bf16.mxu0 %v3263_v20  ;;  %1936 = vmatprep.mubr.bf16.mxu1 %v3263_v20 }
  0x99   :  { %1743 = vmatpush1.bf16.msra.mxu0 %v2953_v28  ;;  %1907 = vmatpush1.bf16.msra.mxu1 %v2956_v29  ;;  %v3047_v28 = vld [vmem:[#allocation2 + $0x608] ss:$16 sps:$4 sm:$0xff]   ;;  %v3052_v29 = vld [vmem:[#allocation2 + $0x624] ss:$16 sps:$4 sm:$0xff]  }
  0x9a   :  { %1744 = vmatprep.subr.bf16.mxu0 %v2961_v30  ;;  %1908 = vmatprep.subr.bf16.mxu1 %v2964_v31  ;;  %v3055_v30 = vld [vmem:[#allocation2 + $0x62c] ss:$16 sps:$4 sm:$0xff]   ;;  %v369_v31 = vcombine.high %v3263_v20, %v3263_v20  ;;  %v3064_v20 = vld [vmem:[#allocation2 + $0x664] ss:$16 sps:$4 sm:$0xff]  }
  0x9d   :  { %1745 = vmatpush1.bf16.msra.mxu0 %v2959_v15  ;;  %1909 = vmatpush1.bf16.msra.mxu1 %v2962_v32  ;;  %v3050_v15 = vld [vmem:[#allocation2 + $0x620] ss:$16 sps:$4 sm:$0xff]   ;;  %v3053_v32 = vld [vmem:[#allocation2 + $0x628] ss:$16 sps:$4 sm:$0xff]  }
  0x9e   :  { %1746 = vmatprep.subr.bf16.mxu0 %v2967_v33  ;;  %1910 = vmatprep.subr.bf16.mxu1 %v2970_v34  ;;  %v3058_v33 = vld [vmem:[#allocation2 + $0x644] ss:$16 sps:$4 sm:$0xff]   ;;  %v3061_v34 = vld [vmem:[#allocation2 + $0x64c] ss:$16 sps:$4 sm:$0xff]  }
  0xa1   :  { %1747 = vmatpush1.bf16.msra.mxu0 %v2965_v35  ;;  %1911 = vmatpush1.bf16.msra.mxu1 %v2968_v36  ;;  %v3056_v35 = vld [vmem:[#allocation2 + $0x640] ss:$16 sps:$4 sm:$0xff]   ;;  %v3059_v36 = vld [vmem:[#allocation2 + $0x648] ss:$16 sps:$4 sm:$0xff]  }
  0xa2   :  { %1748 = vmatprep.subr.bf16.mxu0 %v2973_v37  ;;  %1912 = vmatprep.subr.bf16.mxu1 %v2976_v38  ;;  %v3067_v37 = vld [vmem:[#allocation2 + $0x66c] ss:$16 sps:$4 sm:$0xff]   ;;  %v3062_v38 = vld [vmem:[#allocation2 + $0x660] ss:$16 sps:$4 sm:$0xff]  }
  0xa5   :  { %1749 = vmatpush1.bf16.msra.mxu0 %v2971_v39  ;;  %1913 = vmatpush1.bf16.msra.mxu1 %v2974_v40  ;;  %v3065_v39 = vld [vmem:[#allocation2 + $0x668] ss:$16 sps:$4 sm:$0xff]   ;;  %v3070_v40 = vld [vmem:[#allocation2 + $0x684] ss:$16 sps:$4 sm:$0xff]  }
  0xa6   :  { %1750 = vmatprep.subr.bf16.mxu0 %v2979_v41  ;;  %1914 = vmatprep.subr.bf16.mxu1 %v2982_v43  ;;  %v3073_v41 = vld [vmem:[#allocation2 + $0x68c] ss:$16 sps:$4 sm:$0xff]   ;;  %v3068_v43 = vld [vmem:[#allocation2 + $0x680] ss:$16 sps:$4 sm:$0xff]  }
  0xa9   :  { %1751 = vmatpush1.bf16.msra.mxu0 %v2977_v44  ;;  %1915 = vmatpush1.bf16.msra.mxu1 %v2980_v45  ;;  %v3071_v44 = vld [vmem:[#allocation2 + $0x688] ss:$16 sps:$4 sm:$0xff]   ;;  %v3076_v45 = vld [vmem:[#allocation2 + $0x6a4] ss:$16 sps:$4 sm:$0xff]  }
  0xaa   :  { %1752 = vmatprep.subr.bf16.mxu0 %v2985_v46  ;;  %1916 = vmatprep.subr.bf16.mxu1 %v2988_v47  ;;  %v3079_v46 = vld [vmem:[#allocation2 + $0x6ac] ss:$16 sps:$4 sm:$0xff]   ;;  %v3074_v47 = vld [vmem:[#allocation2 + $0x6a0] ss:$16 sps:$4 sm:$0xff]  }
  0xad   :  { %1753 = vmatpush1.bf16.msra.mxu0 %v2983_v48  ;;  %1917 = vmatpush1.bf16.msra.mxu1 %v2986_v49  ;;  %v3077_v48 = vld [vmem:[#allocation2 + $0x6a8] ss:$16 sps:$4 sm:$0xff]   ;;  %v3082_v49 = vld [vmem:[#allocation2 + $0x6c4] ss:$16 sps:$4 sm:$0xff]  }
  0xae   :  { %1754 = vmatprep.subr.bf16.mxu0 %v2991_v50  ;;  %1918 = vmatprep.subr.bf16.mxu1 %v2994_v51  ;;  %v3085_v50 = vld [vmem:[#allocation2 + $0x6cc] ss:$16 sps:$4 sm:$0xff]   ;;  %v3080_v51 = vld [vmem:[#allocation2 + $0x6c0] ss:$16 sps:$4 sm:$0xff]  }
  0xb1   :  { %1755 = vmatpush1.bf16.msra.mxu0 %v2989_v52  ;;  %1919 = vmatpush1.bf16.msra.mxu1 %v2992_v53  ;;  %v3083_v52 = vld [vmem:[#allocation2 + $0x6c8] ss:$16 sps:$4 sm:$0xff]   ;;  %v3088_v53 = vld [vmem:[#allocation2 + $0x6e4] ss:$16 sps:$4 sm:$0xff]  }
  0xb2   :  { %1756 = vmatprep.subr.bf16.mxu0 %v2997_v54  ;;  %1920 = vmatprep.subr.bf16.mxu1 %v3000_v55  ;;  %v3091_v54 = vld [vmem:[#allocation2 + $0x6ec] ss:$16 sps:$4 sm:$0xff]   ;;  %v3086_v55 = vld [vmem:[#allocation2 + $0x6e0] ss:$16 sps:$4 sm:$0xff]  }
  0xb5   :  { %1757 = vmatpush1.bf16.msra.mxu0 %v2995_v56  ;;  %1921 = vmatpush1.bf16.msra.mxu1 %v2998_v57  ;;  %v3089_v56 = vld [vmem:[#allocation2 + $0x6e8] ss:$16 sps:$4 sm:$0xff]   ;;  %v3094_v57 = vld [vmem:[#allocation2 + $0x704] ss:$16 sps:$4 sm:$0xff]  }
  0xb6   :  { %1758 = vmatprep.subr.bf16.mxu0 %v3003_v58  ;;  %1922 = vmatprep.subr.bf16.mxu1 %v3006_v59  ;;  %v3097_v58 = vld [vmem:[#allocation2 + $0x70c] ss:$16 sps:$4 sm:$0xff]   ;;  %v3092_v59 = vld [vmem:[#allocation2 + $0x700] ss:$16 sps:$4 sm:$0xff]  }
  0xb9   :  { %1759 = vmatpush1.bf16.msra.mxu0 %v3001_v60  ;;  %1923 = vmatpush1.bf16.msra.mxu1 %v3004_v61  ;;  %v3095_v60 = vld [vmem:[#allocation2 + $0x708] ss:$16 sps:$4 sm:$0xff]   ;;  %v3100_v61 = vld [vmem:[#allocation2 + $0x724] ss:$16 sps:$4 sm:$0xff]  }
  0xba   :  { %1760 = vmatprep.subr.bf16.mxu0 %v3009_v62  ;;  %1924 = vmatprep.subr.bf16.mxu1 %v3012_v63  ;;  %v3103_v62 = vld [vmem:[#allocation2 + $0x72c] ss:$16 sps:$4 sm:$0xff]   ;;  %v3098_v63 = vld [vmem:[#allocation2 + $0x720] ss:$16 sps:$4 sm:$0xff]  }
  0xbd   :  { %1761 = vmatpush1.bf16.msra.mxu0 %v3007_v0  ;;  %1925 = vmatpush1.bf16.msra.mxu1 %v3010_v1  ;;  %v3101_v0 = vld [vmem:[#allocation2 + $0x728] ss:$16 sps:$4 sm:$0xff]   ;;  %v3106_v1 = vld [vmem:[#allocation2 + $0x744] ss:$16 sps:$4 sm:$0xff]  }
  0xbe   :  { %1762 = vmatprep.subr.bf16.mxu0 %v3015_v2  ;;  %1926 = vmatprep.subr.bf16.mxu1 %v3018_v3  ;;  %v3109_v2 = vld [vmem:[#allocation2 + $0x74c] ss:$16 sps:$4 sm:$0xff]   ;;  %v3104_v3 = vld [vmem:[#allocation2 + $0x740] ss:$16 sps:$4 sm:$0xff]  }
  0xc1   :  { %1763 = vmatpush1.bf16.msra.mxu0 %v3013_v4  ;;  %1927 = vmatpush1.bf16.msra.mxu1 %v3016_v5  ;;  %v3107_v4 = vld [vmem:[#allocation2 + $0x748] ss:$16 sps:$4 sm:$0xff]   ;;  %v3112_v5 = vld [vmem:[#allocation2 + $0x764] ss:$16 sps:$4 sm:$0xff]  }
  0xc2   :  { %1764 = vmatprep.subr.bf16.mxu0 %v3021_v6  ;;  %1928 = vmatprep.subr.bf16.mxu1 %v3024_v7  ;;  %v3115_v6 = vld [vmem:[#allocation2 + $0x76c] ss:$16 sps:$4 sm:$0xff]   ;;  %v3110_v7 = vld [vmem:[#allocation2 + $0x760] ss:$16 sps:$4 sm:$0xff]  }
  0xc5   :  { %1765 = vmatpush1.bf16.msra.mxu0 %v3019_v8  ;;  %1929 = vmatpush1.bf16.msra.mxu1 %v3022_v9  ;;  %v3113_v8 = vld [vmem:[#allocation2 + $0x768] ss:$16 sps:$4 sm:$0xff]   ;;  %v3118_v9 = vld [vmem:[#allocation2 + $0x784] ss:$16 sps:$4 sm:$0xff]  }
  0xc6   :  { %1766 = vmatprep.subr.bf16.mxu0 %v3027_v10  ;;  %1930 = vmatprep.subr.bf16.mxu1 %v3030_v11  ;;  %v3121_v10 = vld [vmem:[#allocation2 + $0x78c] ss:$16 sps:$4 sm:$0xff]   ;;  %v3116_v11 = vld [vmem:[#allocation2 + $0x780] ss:$16 sps:$4 sm:$0xff]  }
  0xc9   :  { %1767 = vmatpush1.bf16.msra.mxu0 %v3025_v12  ;;  %1931 = vmatpush1.bf16.msra.mxu1 %v3028_v13  ;;  %v3119_v12 = vld [vmem:[#allocation2 + $0x788] ss:$16 sps:$4 sm:$0xff]   ;;  %v3124_v13 = vld [vmem:[#allocation2 + $0x7a4] ss:$16 sps:$4 sm:$0xff]  }
  0xca   :  { %1768 = vmatprep.subr.bf16.mxu0 %v3033_v14  ;;  %1932 = vmatprep.subr.bf16.mxu1 %v3036_v16  ;;  %v3127_v14 = vld [vmem:[#allocation2 + $0x7ac] ss:$16 sps:$4 sm:$0xff]   ;;  %v3122_v16 = vld [vmem:[#allocation2 + $0x7a0] ss:$16 sps:$4 sm:$0xff]  }
  0xcd   :  { %1769 = vmatpush1.bf16.msra.mxu0 %v3031_v17  ;;  %1933 = vmatpush1.bf16.msra.mxu1 %v3034_v18  ;;  %v3125_v17 = vld [vmem:[#allocation2 + $0x7a8] ss:$16 sps:$4 sm:$0xff]   ;;  %v3130_v18 = vld [vmem:[#allocation2 + $0x7c4] ss:$16 sps:$4 sm:$0xff]  }
  0xce   :  { %1770 = vmatprep.subr.bf16.mxu0 %v3039_v19  ;;  %1934 = vmatprep.subr.bf16.mxu1 %v3042_v22  ;;  %v3133_v19 = vld [vmem:[#allocation2 + $0x7cc] ss:$16 sps:$4 sm:$0xff]   ;;  %v3128_v22 = vld [vmem:[#allocation2 + $0x7c0] ss:$16 sps:$4 sm:$0xff]  }
  0xd1   :  { %1771 = vmatpush1.bf16.msra.mxu0 %v3037_v23  ;;  %1935 = vmatpush1.bf16.msra.mxu1 %v3040_v24  ;;  %v3131_v23 = vld [vmem:[#allocation2 + $0x7c8] ss:$16 sps:$4 sm:$0xff]   ;;  %v3136_v24 = vld [vmem:[#allocation2 + $0x7e4] ss:$16 sps:$4 sm:$0xff]  }
  0xd2   :  { %1781 = vmatprep.subr.bf16.mxu0 %v3046_v25  ;;  %1945 = vmatprep.subr.bf16.mxu1 %v3049_v26  ;;  %v3139_v25 = vld [vmem:[#allocation2 + $0x7ec] ss:$16 sps:$4 sm:$0xff]   ;;  %v2006_v26 = vld [vmem:[%s3512_s3 + $0x80] sm:$0xff] }
  0xd4   :  { %1773 = vmatmul.mubr.bf16.vlgmr.msra.gmra.mrb[0].mxu0 %v3266_v21  ;;  %1937 = vmatmul.mubr.bf16.vlgmr.msra.gmra.mrb[0].mxu1 %v3266_v21 }
  0xd5   :  { %1782 = vmatpush1.bf16.msra.mxu0 %v3044_v27  ;;  %1946 = vmatpush1.bf16.msra.mxu1 %v3047_v28  ;;  %v2007_v27 = vld [vmem:[%s3512_s3 + $0x88] sm:$0xff]  ;;  %v2038_v28 = vld [vmem:[%s3512_s3 + $0x180] sm:$0xff] }
  0xd6   :  { %1783 = vmatprep.subr.bf16.mxu0 %v3052_v29  ;;  %1947 = vmatprep.subr.bf16.mxu1 %v3055_v30  ;;  %v2039_v29 = vld [vmem:[%s3512_s3 + $0x188] sm:$0xff]  ;;  %v3134_v30 = vld [vmem:[#allocation2 + $0x7e0] ss:$16 sps:$4 sm:$0xff]  }
  0xd7   :  { %1813 = vmatprep.mubr.bf16.mxu0 %v369_v31  ;;  %1977 = vmatprep.mubr.bf16.mxu1 %v369_v31  ;;  %v3137_v31 = vld [vmem:[#allocation2 + $0x7e8] ss:$16 sps:$4 sm:$0xff]  }
  0xd9   :  { %1784 = vmatpush1.bf16.msra.mxu0 %v3050_v15  ;;  %1948 = vmatpush1.bf16.msra.mxu1 %v3053_v32  ;;  %v1990_v15 = vld [vmem:[%s3512_s3] sm:$0xff]  ;;  %v1991_v32 = vld [vmem:[%s3512_s3 + $0x8] sm:$0xff] }
  0xda   :  { %1785 = vmatprep.subr.bf16.mxu0 %v3058_v33  ;;  %1949 = vmatprep.subr.bf16.mxu1 %v3061_v34  ;;  %v2649_v33 = vpack.c.bf16 %v2007_v27, %v2006_v26  ;;  %v2681_v34 = vpack.c.bf16 %v2039_v29, %v2038_v28  ;;  %v2048_v26 = vld [vmem:[%s3512_s3 + $0x1d0] sm:$0xff]  ;;  %v2049_v27 = vld [vmem:[%s3512_s3 + $0x1d8] sm:$0xff] }
  0xdd   :  { %1786 = vmatpush1.bf16.msra.mxu0 %v3056_v35  ;;  %1950 = vmatpush1.bf16.msra.mxu1 %v3059_v36  ;;  %v2022_v35 = vld [vmem:[%s3512_s3 + $0x100] sm:$0xff]  ;;  %v2023_v36 = vld [vmem:[%s3512_s3 + $0x108] sm:$0xff] }
  0xde   :  { %1787 = vmatprep.subr.bf16.mxu0 %v3064_v20  ;;  %1951 = vmatprep.subr.bf16.mxu1 %v3067_v37  ;;  %v2008_v20 = vld [vmem:[%s3512_s3 + $0x90] sm:$0xff]  ;;  %v2009_v37 = vld [vmem:[%s3512_s3 + $0x98] sm:$0xff] }
  0xe1   :  { %1788 = vmatpush1.bf16.msra.mxu0 %v3062_v38  ;;  %1952 = vmatpush1.bf16.msra.mxu1 %v3065_v39  ;;  %v2040_v38 = vld [vmem:[%s3512_s3 + $0x190] sm:$0xff]  ;;  %v2041_v39 = vld [vmem:[%s3512_s3 + $0x198] sm:$0xff] }
  0xe2   :  { %1789 = vmatprep.subr.bf16.mxu0 %v3070_v40  ;;  %1953 = vmatprep.subr.bf16.mxu1 %v3073_v41  ;;  %v367_v40 = vcombine.high %v3266_v21, %v3266_v21  ;;  %v2651_v41 = vpack.c.bf16 %v1991_v32, %v1990_v15  ;;  %v2024_v21 = vld [vmem:[%s3512_s3 + $0x110] sm:$0xff]  ;;  %v2701_v32 = vpack.c.bf16 %v2049_v27, %v2048_v26  ;;  %v3192_v26 = vmov 0.0|0.0  }
  0xe3   :  { %v2204_v27 = vld [vmem:[%s3514_s5 + $0x10] sm:$0xff] }
  0xe5   :  { %1790 = vmatpush1.bf16.msra.mxu0 %v3068_v43  ;;  %1954 = vmatpush1.bf16.msra.mxu1 %v3071_v44  ;;  %v2683_v43 = vpack.c.bf16 %v2023_v36, %v2022_v35  ;;  %v1992_v44 = vld [vmem:[%s3512_s3 + $0x10] sm:$0xff]  ;;  %v2018_v35 = vld [vmem:[%s3512_s3 + $0xe0] sm:$0xff]  ;;  %v2019_v36 = vld [vmem:[%s3512_s3 + $0xe8] sm:$0xff] }
  0xe6   :  { %1791 = vmatprep.subr.bf16.mxu0 %v3076_v45  ;;  %1955 = vmatprep.subr.bf16.mxu1 %v3079_v46  ;;  %v1993_v45 = vld [vmem:[%s3512_s3 + $0x18] sm:$0xff]  ;;  %v2653_v46 = vpack.c.bf16 %v2009_v37, %v2008_v20  ;;  %v2050_v20 = vld [vmem:[%s3512_s3 + $0x1e0] sm:$0xff]  ;;  %v2051_v37 = vld [vmem:[%s3512_s3 + $0x1e8] sm:$0xff] }
  0xe9   :  { %1792 = vmatpush1.bf16.msra.mxu0 %v3074_v47  ;;  %1956 = vmatpush1.bf16.msra.mxu1 %v3077_v48  ;;  %v2685_v47 = vpack.c.bf16 %v2041_v39, %v2040_v38  ;;  %v2025_v48 = vld [vmem:[%s3512_s3 + $0x118] sm:$0xff] }
  0xea   :  { %1793 = vmatprep.subr.bf16.mxu0 %v3082_v49  ;;  %1957 = vmatprep.subr.bf16.mxu1 %v3085_v50  ;;  %v2010_v49 = vld [vmem:[%s3512_s3 + $0xa0] sm:$0xff]  ;;  %v2011_v50 = vld [vmem:[%s3512_s3 + $0xa8] sm:$0xff] }
  0xed   :  { %1794 = vmatpush1.bf16.msra.mxu0 %v3080_v51  ;;  %1958 = vmatpush1.bf16.msra.mxu1 %v3083_v52  ;;  %v2042_v51 = vld [vmem:[%s3512_s3 + $0x1a0] sm:$0xff]  ;;  %v2043_v52 = vld [vmem:[%s3512_s3 + $0x1a8] sm:$0xff] }
  0xee   :  { %1795 = vmatprep.subr.bf16.mxu0 %v3088_v53  ;;  %1959 = vmatprep.subr.bf16.mxu1 %v3091_v54  ;;  %v2655_v53 = vpack.c.bf16 %v1993_v45, %v1992_v44  ;;  %v2687_v54 = vpack.c.bf16 %v2025_v48, %v2024_v21  ;;  %v2003_v44 = vld [vmem:[%s3512_s3 + $0x68] sm:$0xff]  ;;  %v2034_v45 = vld [vmem:[%s3512_s3 + $0x160] sm:$0xff]  ;;  %v2020_v48 = vld [vmem:[%s3512_s3 + $0xf0] sm:$0xff] }
  0xf1   :  { %1796 = vmatpush1.bf16.msra.mxu0 %v3086_v55  ;;  %1960 = vmatpush1.bf16.msra.mxu1 %v3089_v56  ;;  %v1994_v55 = vld [vmem:[%s3512_s3 + $0x20] sm:$0xff]  ;;  %v1995_v56 = vld [vmem:[%s3512_s3 + $0x28] sm:$0xff] }
  0xf2   :  { %1797 = vmatprep.subr.bf16.mxu0 %v3094_v57  ;;  %1961 = vmatprep.subr.bf16.mxu1 %v3097_v58  ;;  %v2657_v57 = vpack.c.bf16 %v2011_v50, %v2010_v49  ;;  %v2689_v58 = vpack.c.bf16 %v2043_v52, %v2042_v51  ;;  %v2021_v49 = vld [vmem:[%s3512_s3 + $0xf8] sm:$0xff]  ;;  %v2052_v50 = vld [vmem:[%s3512_s3 + $0x1f0] sm:$0xff] }
  0xf3   :  { %v2677_v51 = vpack.c.bf16 %v2021_v49, %v2020_v48  ;;  %v2053_v52 = vld [vmem:[%s3512_s3 + $0x1f8] sm:$0xff] }
  0xf5   :  { %1798 = vmatpush1.bf16.msra.mxu0 %v3092_v59  ;;  %1962 = vmatpush1.bf16.msra.mxu1 %v3095_v60  ;;  %v2026_v59 = vld [vmem:[%s3512_s3 + $0x120] sm:$0xff]  ;;  %v2027_v60 = vld [vmem:[%s3512_s3 + $0x128] sm:$0xff] }
  0xf6   :  { %1799 = vmatprep.subr.bf16.mxu0 %v3100_v61  ;;  %1963 = vmatprep.subr.bf16.mxu1 %v3103_v62  ;;  %v2012_v61 = vld [vmem:[%s3512_s3 + $0xb0] sm:$0xff]  ;;  %v2013_v62 = vld [vmem:[%s3512_s3 + $0xb8] sm:$0xff] }
  0xf9   :  { %1800 = vmatpush1.bf16.msra.mxu0 %v3098_v63  ;;  %1964 = vmatpush1.bf16.msra.mxu1 %v3101_v0  ;;  %v2044_v63 = vld [vmem:[%s3512_s3 + $0x1b0] sm:$0xff]  ;;  %v2045_v0 = vld [vmem:[%s3512_s3 + $0x1b8] sm:$0xff] }
  0xfa   :  { %1801 = vmatprep.subr.bf16.mxu0 %v3106_v1  ;;  %1965 = vmatprep.subr.bf16.mxu1 %v3109_v2  ;;  %v2659_v1 = vpack.c.bf16 %v1995_v56, %v1994_v55  ;;  %v2691_v2 = vpack.c.bf16 %v2027_v60, %v2026_v59  ;;  %v2709_v55 = vpack.c.bf16 %v2053_v52, %v2052_v50  ;;  %v302_v60 = vsub.s32 0, %v3248_v42 }
  0xfd   :  { %1802 = vmatpush1.bf16.msra.mxu0 %v3104_v3  ;;  %1966 = vmatpush1.bf16.msra.mxu1 %v3107_v4  ;;  %v1996_v3 = vld [vmem:[%s3512_s3 + $0x30] sm:$0xff]  ;;  %v1997_v4 = vld [vmem:[%s3512_s3 + $0x38] sm:$0xff] }
  0xfe   :  { %1803 = vmatprep.subr.bf16.mxu0 %v3112_v5  ;;  %1967 = vmatprep.subr.bf16.mxu1 %v3115_v6  ;;  %v2661_v5 = vpack.c.bf16 %v2013_v62, %v2012_v61  ;;  %v2693_v6 = vpack.c.bf16 %v2045_v0, %v2044_v63  ;;  %v310_v61 = vsub.s32 2, %v3248_v42  ;;  %v298_v62 = vld [vmem:[%s3511_s2] sm:$0xf]  ;;  %v306_v63 = vsub.s32 1, %v3248_v42 }
  0xff   :  { %v314_v0 = vsub.s32 3, %v3248_v42 }
 0x101   :  { %1804 = vmatpush1.bf16.msra.mxu0 %v3110_v7  ;;  %1968 = vmatpush1.bf16.msra.mxu1 %v3113_v8  ;;  %v2028_v7 = vld [vmem:[%s3512_s3 + $0x130] sm:$0xff]  ;;  %v2029_v8 = vld [vmem:[%s3512_s3 + $0x138] sm:$0xff] }
 0x102   :  { %1805 = vmatprep.subr.bf16.mxu0 %v3118_v9  ;;  %1969 = vmatprep.subr.bf16.mxu1 %v3121_v10  ;;  %v2014_v9 = vld [vmem:[%s3512_s3 + $0xc0] sm:$0xff]  ;;  %v2015_v10 = vld [vmem:[%s3512_s3 + $0xc8] sm:$0xff] }
 0x105   :  { %1806 = vmatpush1.bf16.msra.mxu0 %v3116_v11  ;;  %1970 = vmatpush1.bf16.msra.mxu1 %v3119_v12  ;;  %v2046_v11 = vld [vmem:[%s3512_s3 + $0x1c0] sm:$0xff]  ;;  %v2047_v12 = vld [vmem:[%s3512_s3 + $0x1c8] sm:$0xff] }
 0x106   :  { %1807 = vmatprep.subr.bf16.mxu0 %v3124_v13  ;;  %1971 = vmatprep.subr.bf16.mxu1 %v3127_v14  ;;  %v2663_v13 = vpack.c.bf16 %v1997_v4, %v1996_v3  ;;  %v2695_v14 = vpack.c.bf16 %v2029_v8, %v2028_v7  ;;  %v307_v3 = vrot.slane %v298_v62, %v306_v63 }
 0x107   :  { %v315_v4 = vrot.slane %v298_v62, %v314_v0 }
 0x109   :  { %1808 = vmatpush1.bf16.msra.mxu0 %v3122_v16  ;;  %1972 = vmatpush1.bf16.msra.mxu1 %v3125_v17  ;;  %v1998_v16 = vld [vmem:[%s3512_s3 + $0x40] sm:$0xff]  ;;  %v1999_v17 = vld [vmem:[%s3512_s3 + $0x48] sm:$0xff] }
 0x10a   :  { %1809 = vmatprep.subr.bf16.mxu0 %v3130_v18  ;;  %1973 = vmatprep.subr.bf16.mxu1 %v3133_v19  ;;  %v2665_v18 = vpack.c.bf16 %v2015_v10, %v2014_v9  ;;  %v2697_v19 = vpack.c.bf16 %v2047_v12, %v2046_v11  ;;  %v2667_v28 = vpack.c.bf16 %v1999_v17, %v1998_v16 }
 0x10d   :  { %1810 = vmatpush1.bf16.msra.mxu0 %v3128_v22  ;;  %1974 = vmatpush1.bf16.msra.mxu1 %v3131_v23  ;;  %v2030_v22 = vld [vmem:[%s3512_s3 + $0x140] sm:$0xff]  ;;  %v2031_v23 = vld [vmem:[%s3512_s3 + $0x148] sm:$0xff] }
 0x10e   :  { %1811 = vmatprep.subr.bf16.mxu0 %v3136_v24  ;;  %1975 = vmatprep.subr.bf16.mxu1 %v3139_v25  ;;  %v2016_v24 = vld [vmem:[%s3512_s3 + $0xd0] sm:$0xff]  ;;  %v2017_v25 = vld [vmem:[%s3512_s3 + $0xd8] sm:$0xff]  ;;  %v2699_v29 = vpack.c.bf16 %v2031_v23, %v2030_v22  ;;  %v2202_v23 = vld [vmem:[%s3514_s5] sm:$0xff] }
 0x10f   :  { %v2669_v15 = vpack.c.bf16 %v2017_v25, %v2016_v24  ;;  %v2203_v24 = vld [vmem:[%s3514_s5 + $0x8] sm:$0xff] }
 0x110   :  { %v2714_v25 = vpack.c.bf16 %v2203_v24, %v2202_v23 }
 0x111   :  { %1812 = vmatpush1.bf16.msra.mxu0 %v3134_v30  ;;  %1976 = vmatpush1.bf16.msra.mxu1 %v3137_v31  ;;  %v2000_v30 = vld [vmem:[%s3512_s3 + $0x50] sm:$0xff]  ;;  %v2001_v31 = vld [vmem:[%s3512_s3 + $0x58] sm:$0xff] }
 0x112   :  { %2650 = vmatprep.subr.bf16.mxu0 %v2649_v33  ;;  %2682 = vmatprep.subr.bf16.mxu1 %v2681_v34  ;;  %v2032_v33 = vld [vmem:[%s3512_s3 + $0x150] sm:$0xff]  ;;  %v2033_v34 = vld [vmem:[%s3512_s3 + $0x158] sm:$0xff]  ;;  %v2671_v38 = vpack.c.bf16 %v2001_v31, %v2000_v30  ;;  %v3194_v30 = vmov 0.0  }
 0x113   :  { %v2703_v39 = vpack.c.bf16 %v2033_v34, %v2032_v33 }
 0x114   :  { %1814 = vmatmul.mubr.bf16.vlgmr.msra.gmra.mrb[0].mxu0 %v367_v40  ;;  %1978 = vmatmul.mubr.bf16.vlgmr.msra.gmra.mrb[0].mxu1 %v367_v40  ;;  %v2673_v40 = vpack.c.bf16 %v2019_v36, %v2018_v35 }
 0x115   :  { %2652 = vmatpush3.bf16.msra.mxu0 %v2651_v41  ;;  %2684 = vmatpush3.bf16.msra.mxu1 %v2683_v43  ;;  %v2705_v41 = vpack.c.bf16 %v2051_v37, %v2050_v20  ;;  %v2002_v43 = vld [vmem:[%s3512_s3 + $0x60] sm:$0xff] }
 0x116   :  { %2654 = vmatprep.subr.bf16.mxu0 %v2653_v46  ;;  %2686 = vmatprep.subr.bf16.mxu1 %v2685_v47  ;;  %v2675_v46 = vpack.c.bf16 %v2003_v44, %v2002_v43  ;;  %v2035_v47 = vld [vmem:[%s3512_s3 + $0x168] sm:$0xff] }
 0x117   :  { %v2707_v21 = vpack.c.bf16 %v2035_v47, %v2034_v45 }
 0x119   :  { %2656 = vmatpush3.bf16.msra.mxu0 %v2655_v53  ;;  %2688 = vmatpush3.bf16.msra.mxu1 %v2687_v54  ;;  %v2004_v53 = vld [vmem:[%s3512_s3 + $0x70] sm:$0xff]  ;;  %v2005_v54 = vld [vmem:[%s3512_s3 + $0x78] sm:$0xff] }
 0x11a   :  { %2658 = vmatprep.subr.bf16.mxu0 %v2657_v57  ;;  %2690 = vmatprep.subr.bf16.mxu1 %v2689_v58  ;;  %v2679_v56 = vpack.c.bf16 %v2005_v54, %v2004_v53  ;;  %v2036_v57 = vld [vmem:[%s3512_s3 + $0x170] sm:$0xff]  ;;  %v2037_v58 = vld [vmem:[%s3512_s3 + $0x178] sm:$0xff] }
 0x11b   :  { %v2711_v59 = vpack.c.bf16 %v2037_v58, %v2036_v57 }
 0x11d   :  { %2660 = vmatpush3.bf16.msra.mxu0 %v2659_v1  ;;  %2692 = vmatpush3.bf16.msra.mxu1 %v2691_v2  ;;  %v303_v1 = vrot.slane %v298_v62, %v302_v60  ;;  %v311_v2 = vrot.slane %v298_v62, %v310_v61 }
 0x11e   :  { %2662 = vmatprep.subr.bf16.mxu0 %v2661_v5  ;;  %2694 = vmatprep.subr.bf16.mxu1 %v2693_v6 }
 0x121   :  { %2664 = vmatpush3.bf16.msra.mxu0 %v2663_v13  ;;  %2696 = vmatpush3.bf16.msra.mxu1 %v2695_v14 }
 0x122   :  { %2666 = vmatprep.subr.bf16.mxu0 %v2665_v18  ;;  %2698 = vmatprep.subr.bf16.mxu1 %v2697_v19 }
 0x125   :  { %2668 = vmatpush3.bf16.msra.mxu0 %v2667_v28  ;;  %2700 = vmatpush3.bf16.msra.mxu1 %v2699_v29  ;;  %v2205_v28 = vld [vmem:[%s3514_s5 + $0x18] sm:$0xff] }
 0x126   :  { %2670 = vmatprep.subr.bf16.mxu0 %v2669_v15  ;;  %2702 = vmatprep.subr.bf16.mxu1 %v2701_v32  ;;  %v2717_v29 = vpack.c.bf16 %v2205_v28, %v2204_v27  ;;  %v2560_v32 = vld [vmem:[%s3513_s4] ss:$0 sm:$0xff]  ;;  %s3162_s4 = scalar_lea.vmem %s2296_s30, 32 }
 0x127   :  { %p3163_p8 = scmp.ne.s32.totalorder %s2296_s30, %s3162_s4  ;;  %p3168_p10 = scmp.lt.s32.totalorder %s3162_s4, %s3162_s4 }
 0x129   :  { %2672 = vmatpush3.bf16.msra.mxu0 %v2671_v38  ;;  %2704 = vmatpush3.bf16.msra.mxu1 %v2703_v39  ;;  %v2561_v39 = vld [vmem:[%s3515_s6] ss:$0 sm:$0xff]  ;;  %p3169_p11 = por %p3168_p10, %p3167_p9 }
 0x12a   :  { %2674 = vmatprep.subr.bf16.mxu0 %v2673_v40  ;;  %2706 = vmatprep.subr.bf16.mxu1 %v2705_v41 }
 0x12b   :  { %p3170_p12 = pnand %p3169_p11, %p3163_p8 }
 0x12d   :  { %2676 = vmatpush3.bf16.msra.mxu0 %v2675_v46  ;;  %2708 = vmatpush3.bf16.msra.mxu1 %v2707_v21 }
 0x12e   :  { %2678 = vmatprep.subr.bf16.mxu0 %v2677_v51  ;;  %2710 = vmatprep.subr.bf16.mxu1 %v2709_v55 }
 0x131   :  { %2680 = vmatpush3.bf16.msra.mxu0 %v2679_v56  ;;  %2712 = vmatpush3.bf16.msra.mxu1 %v2711_v59 }
 0x132   :  { %2713 = vmatprep.subr.bf16.mxu0 %v3192_v26 }
 0x1e7   :  { %v1815_v5 = vpop.f32.mrb[0].mxu0  ;;  %v1979_v6 = vpop.f32.mrb[0].mxu1 }
 0x1e8   :  { %v2719_v7 = vadd.f32 %v1815_v5, %v303_v1  ;;  %v2721_v8 = vadd.f32 %v1979_v6, %v311_v2  ;;  %v1817_v9 = vpop.f32.mrb[1].mxu0  ;;  %v1981_v10 = vpop.f32.mrb[1].mxu1 }
 0x1e9   :  { %v2720_v11 = vadd.f32 %v1817_v9, %v307_v3  ;;  %v2722_v12 = vadd.f32 %v1981_v10, %v315_v4  ;;  %v1819_v13 = vpop.f32.mrb[2].mxu0  ;;  %v1983_v14 = vpop.f32.mrb[2].mxu1 }
 0x1ea   :  { %v1820_v16 = vpop.f32.mrb[3].mxu0  ;;  %v1984_v17 = vpop.f32.mrb[3].mxu1  ;;  %v1986_v22 = vmax.f32 %v2719_v7, 0.0  ;;  %v1988_v42 = vmax.f32 %v2721_v8, 0.0 }
 0x1eb   :  { %v1987_v18 = vmax.f32 %v2720_v11, 0.0  ;;  %v1989_v19 = vmax.f32 %v2722_v12, 0.0 }
 0x1ed   :  { %2125 = vmatprep.mubr.f32.mxu0 %v1987_v18  ;;  %2195 = vmatprep.mubr.f32.mxu1 %v1989_v19 }
 0x1ee   :  { %2126 = vmatmul.mubr.f32.vlgmr.msra.gmra.mrb[4].mxu0 %v1986_v22  ;;  %2196 = vmatmul.mubr.f32.vlgmr.msra.gmra.mrb[4].mxu1 %v1988_v42 }
 0x1ef   :  { %2715 = vmatpush3.bf16.msra.mxu0 %v2714_v25  ;;  %2646 = vmatprep.mubr.msk.f32.mxu0 %vm3193_vm0, %v3194_v30 }
 0x1f0   :  { %2716 = vmatprep.subr.bf16.mxu0 %v3192_v26 }
 0x1f3   :  { %2718 = vmatpush3.bf16.msra.mxu0 %v2717_v29 }
 0x2c1   :  { %v2595_v31 = vpop.f32.mrb[4].mxu0  ;;  %v2630_v15 = vpop.f32.mrb[4].mxu1 }
 0x2c2   :  { %v2596_v33 = vpop.f32.mrb[5].mxu0  ;;  %v2631_v34 = vpop.f32.mrb[5].mxu1 }
 0x2c3   :  { %v2597_v35 = vadd.f32 %v2596_v33, %v2595_v31  ;;  %v2632_v36 = vadd.f32 %v2631_v34, %v2630_v15 }
 0x2c5   :  { %v2128_v20 = vadd.f32 %v2597_v35, %v2560_v32 }
 0x2c7   :  { %v2198_v37 = vadd.f32 %v2632_v36, %v2128_v20 }
 0x2c9   :  { %v2201_v38 = vmax.f32 %v2198_v37, 0.0 }
 0x2cb   :  { %2647 = vmatmul.mubr.msk.f32.vlgmr.msra.gmra.mrb[6].mxu0 %vm2213_vm1, %v2201_v38 }
 0x39e   :  { %v2283_v40 = vpop.f32.mrb[6].mxu0 }
 0x39f   :  { %v2284_v41 = vadd.f32 %v2561_v39, %v2283_v40  ;;  %v2648_v43 = vpop.f32.mrb[7].mxu0 }
 0x3a1   :  { %2288 = vst.msk [vmem:[#allocation5] sm:$0x3] %vm2287_vm2, %v2284_v41 }
 0x3a2   :  { %3173 = shalt.err (!%p3170_p12)
}
 0x3a3   :  { %s3174_s10 = scalar_lea.hbm %s3516_s7, 32 }
 0x3a4   :  { %p3175_p13 = scmp.ne.s32.totalorder %s3516_s7, %s3174_s10  ;;  %p3178_p0 = scmp.lt.u32.totalorder %s3174_s10, %s3516_s7 }
 0x3a6   :  { %p3180_p1 = pnand %p3178_p0, %p3175_p13 }
 0x3a8   :  { %3183 = shalt.err (!%p3180_p1)
}
 0x3a9   :  { %2298 = dma.vmem_to_hbm [thread:$0]  %s2296_s30, 32, %s3516_s7, [#allocation4]  }
 0x3aa   :  { %3186 = dma.done.wait [#allocation4], 32  }
 0x3ab   :  { %3187 = vsyncadd [#allocation4], 4294967264 }
 0x3ac   :  { %2302 = vsyncpa [#allocation3], 1 }
 0x3ad   :  { %2303 = vsyncpa [#allocation4], 1 }

</bundles_post_ra>
